<compile_context>
chip_gen: v7x
topology: tpu7x:2x2x1
jax: 0.10.0
libtpu: 0.0.40
codegen_flags: <defaults>
</compile_context>

<pallas_src>
import functools
import math

import jax
import jax.numpy as jnp
from jax import lax
from jax.experimental import pallas as pl
from jax.experimental.pallas import tpu as pltpu


# ----------------------------------------------------------------------------
# Tiling configuration
# ----------------------------------------------------------------------------
_TM = 256     # rows of the activation matrix per block
_TN = 512     # output columns per block (plain matmul)
_TK = 512     # contraction block
_TF = 256     # FFN hidden-dim block (kept small so bf16 W1/W2 streams fit v7x's 64 MiB VMEM)
_TQ = 256     # flash-attention query tile
_TKV = 512    # flash-attention key/value tile


def _vmem_limit_bytes():
    """Generation-aware scoped-VMEM request: ~75% of physical VMEM, capped at 96 MiB.

    v7x (64 MiB physical) -> 48 MiB; v5e/v6e (128 MiB) -> 96 MiB.
    """
    try:
        cap = pltpu.get_tpu_info().vmem_capacity_bytes
    except Exception:
        cap = 64 * 1024 * 1024
    return int(min(cap * 3 // 4, 96 * 1024 * 1024))


_VMEM_LIMIT = _vmem_limit_bytes()


def _tile(dim, pref):
    """Largest tile <= pref that evenly divides dim, preferring 128-aligned, then 16, then 8.

    Never produces a silently huge whole-dim block unless dim has no 8-aligned divisor <= pref.
    # TODO(synk): masked remainder blocks for truly ragged dims.
    """
    if dim <= pref:
        return dim
    for quantum in (128, 16, 8):
        t = (pref // quantum) * quantum
        while t >= quantum:
            if dim % t == 0:
                return t
            t -= quantum
    return dim


# ----------------------------------------------------------------------------
# Kernel 1: tiled matmul (QKV / Q / KV projections), bf16 inputs, f32 accumulation
# ----------------------------------------------------------------------------

def _matmul_kernel(x_ref, w_ref, o_ref, acc_ref):
    @pl.when(pl.program_id(2) == 0)
    def _():
        acc_ref[...] = jnp.zeros_like(acc_ref)

    acc_ref[...] += jnp.dot(x_ref[...].astype(jnp.bfloat16), w_ref[...],
                            preferred_element_type=jnp.float32)

    @pl.when(pl.program_id(2) == pl.num_programs(2) - 1)
    def _():
        o_ref[...] = acc_ref[...].astype(o_ref.dtype)


def matmul(x2d, w, out_dtype=None):
    """(M, K) @ (K, N) -> (M, N), bias-free (matches nn.Linear(bias=False))."""
    M, K = x2d.shape
    K2, N = w.shape
    assert K == K2
    if out_dtype is None:
        out_dtype = x2d.dtype
    tm, tn, tk = _tile(M, _TM), _tile(N, _TN), _tile(K, _TK)
    bytes_in = x2d.dtype.itemsize * M * K + w.dtype.itemsize * K * N
    return pl.pallas_call(
        _matmul_kernel,
        out_shape=jax.ShapeDtypeStruct((M, N), out_dtype),
        grid_spec=pltpu.PrefetchScalarGridSpec(
            num_scalar_prefetch=0,
            grid=(M // tm, N // tn, K // tk),
            in_specs=[
                pl.BlockSpec((tm, tk), lambda i, j, k: (i, k)),
                pl.BlockSpec((tk, tn), lambda i, j, k: (k, j)),
            ],
            out_specs=pl.BlockSpec((tm, tn), lambda i, j, k: (i, j)),
            scratch_shapes=[pltpu.VMEM((tm, tn), jnp.float32)],
        ),
        compiler_params=pltpu.CompilerParams(
            dimension_semantics=("parallel", "parallel", "arbitrary"),
            vmem_limit_bytes=_VMEM_LIMIT),
        cost_estimate=pl.CostEstimate(
            flops=2 * M * N * K, transcendentals=0,
            bytes_accessed=bytes_in + jnp.dtype(out_dtype).itemsize * M * N),
    )(x2d, w)


# ----------------------------------------------------------------------------
# Kernel 2: tiled matmul with fused (residual add + LayerNorm) epilogue
#           out = LayerNorm(residual + x @ W)    (N = d_model kept whole for row-wise LN)
# ----------------------------------------------------------------------------

def _matmul_res_ln_kernel(x_ref, w_ref, r_ref, g_ref, b_ref, o_ref, acc_ref, *, eps):
    @pl.when(pl.program_id(1) == 0)
    def _():
        acc_ref[...] = jnp.zeros_like(acc_ref)

    acc_ref[...] += jnp.dot(x_ref[...].astype(jnp.bfloat16), w_ref[...],
                            preferred_element_type=jnp.float32)

    @pl.when(pl.program_id(1) == pl.num_programs(1) - 1)
    def _():
        z = acc_ref[...] + r_ref[...].astype(jnp.float32)
        mean = jnp.mean(z, axis=-1, keepdims=True)
        c = z - mean
        var = jnp.mean(c * c, axis=-1, keepdims=True)        # biased variance (PyTorch LN)
        zn = c * lax.rsqrt(var + eps)
        o_ref[...] = (zn * g_ref[...] + b_ref[...]).astype(o_ref.dtype)


def matmul_residual_layernorm(x2d, w, residual, gamma, beta, eps=1e-5):
    M, K = x2d.shape
    N = w.shape[1]
    tm, tk = _tile(M, _TM), _tile(K, _TK)
    kern = functools.partial(_matmul_res_ln_kernel, eps=eps)
    return pl.pallas_call(
        kern,
        out_shape=jax.ShapeDtypeStruct((M, N), residual.dtype),
        grid_spec=pltpu.PrefetchScalarGridSpec(
            num_scalar_prefetch=0,
            grid=(M // tm, K // tk),
            in_specs=[
                pl.BlockSpec((tm, tk), lambda i, k: (i, k)),
                pl.BlockSpec((tk, N), lambda i, k: (k, 0)),
                pl.BlockSpec((tm, N), lambda i, k: (i, 0)),
                pl.BlockSpec((1, N), lambda i, k: (0, 0)),
                pl.BlockSpec((1, N), lambda i, k: (0, 0)),
            ],
            out_specs=pl.BlockSpec((tm, N), lambda i, k: (i, 0)),
            scratch_shapes=[pltpu.VMEM((tm, N), jnp.float32)],
        ),
        compiler_params=pltpu.CompilerParams(
            dimension_semantics=("parallel", "arbitrary"),
            vmem_limit_bytes=_VMEM_LIMIT),
        cost_estimate=pl.CostEstimate(
            flops=2 * M * N * K + 8 * M * N, transcendentals=M,
            bytes_accessed=(x2d.dtype.itemsize * M * K + w.dtype.itemsize * K * N
                            + 4 * (2 * M * N + 2 * N))),
    )(x2d, w, residual, gamma, beta)


# ----------------------------------------------------------------------------
# Kernel 3: fully fused FFN block   out = LayerNorm(x + ReLU(x @ W1) @ W2)
#   Tiled over the hidden (F) dim: only a (tm, tf) ReLU intermediate is live; bf16 W1/W2 stream.
# ----------------------------------------------------------------------------

def _ffn_res_ln_kernel(x_ref, w1_ref, w2_ref, g_ref, b_ref, o_ref, acc_ref, *, eps):
    @pl.when(pl.program_id(1) == 0)
    def _():
        acc_ref[...] = jnp.zeros_like(acc_ref)

    h = jnp.dot(x_ref[...].astype(jnp.bfloat16), w1_ref[...],
                preferred_element_type=jnp.float32)
    h = jnp.maximum(h, 0.0)
    acc_ref[...] += jnp.dot(h.astype(jnp.bfloat16), w2_ref[...],
                            preferred_element_type=jnp.float32)

    @pl.when(pl.program_id(1) == pl.num_programs(1) - 1)
    def _():
        z = acc_ref[...] + x_ref[...].astype(jnp.float32)    # residual = the FFN input block
        mean = jnp.mean(z, axis=-1, keepdims=True)
        c = z - mean
        var = jnp.mean(c * c, axis=-1, keepdims=True)
        zn = c * lax.rsqrt(var + eps)
        o_ref[...] = (zn * g_ref[...] + b_ref[...]).astype(o_ref.dtype)


def ffn_residual_layernorm(x2d, w1, w2, gamma, beta, eps=1e-5):
    M, D = x2d.shape
    F = w1.shape[1]
    tm, tf = _tile(M, _TM), _tile(F, _TF)
    kern = functools.partial(_ffn_res_ln_kernel, eps=eps)
    return pl.pallas_call(
        kern,
        out_shape=jax.ShapeDtypeStruct((M, D), x2d.dtype),
        grid_spec=pltpu.PrefetchScalarGridSpec(
            num_scalar_prefetch=0,
            grid=(M // tm, F // tf),
            in_specs=[
                pl.BlockSpec((tm, D), lambda i, f: (i, 0)),
                pl.BlockSpec((D, tf), lambda i, f: (0, f)),
                pl.BlockSpec((tf, D), lambda i, f: (f, 0)),
                pl.BlockSpec((1, D), lambda i, f: (0, 0)),
                pl.BlockSpec((1, D), lambda i, f: (0, 0)),
            ],
            out_specs=pl.BlockSpec((tm, D), lambda i, f: (i, 0)),
            scratch_shapes=[pltpu.VMEM((tm, D), jnp.float32)],
        ),
        compiler_params=pltpu.CompilerParams(
            dimension_semantics=("parallel", "arbitrary"),
            vmem_limit_bytes=_VMEM_LIMIT),
        cost_estimate=pl.CostEstimate(
            flops=4 * M * D * F + 8 * M * D, transcendentals=M,
            bytes_accessed=(4 * 2 * M * D + w1.dtype.itemsize * 2 * D * F + 8 * D)),
    )(x2d, w1, w2, gamma, beta)


# ----------------------------------------------------------------------------
# Kernel 4: flash-style multi-head attention  softmax(scale * q @ k^T) @ v
#   grid=(B, Sq//tq, Skv//tkv) with online-softmax m/l/acc scratch.  Heads are static column
#   slices of the (tq, D)/(tkv, D) bf16 blocks; per-head results are accumulated in place into
#   the lane-dense (tq, D) acc scratch (no concatenate), and the finalize step does exact
#   per-head division then a single lane-dense store.
#   # TODO(synk): batch >=2 heads per MXU pass to improve utilization when d_head < 128.
# ----------------------------------------------------------------------------

def _flash_mha_kernel(q_ref, k_ref, v_ref, o_ref, m_sc, l_sc, acc_sc,
                      *, n_head, d_head, scale):
    ki = pl.program_id(2)

    @pl.when(ki == 0)
    def _():
        m_sc[...] = jnp.full_like(m_sc, -jnp.inf)
        l_sc[...] = jnp.zeros_like(l_sc)
        acc_sc[...] = jnp.zeros_like(acc_sc)

    q = q_ref[0]          # (tq,  D) bf16
    k = k_ref[0]          # (tkv, D) bf16
    v = v_ref[0]          # (tkv, D) bf16

    for h in range(n_head):                                   # static unroll over heads
        lo = h * d_head
        qh = q[:, lo:lo + d_head]
        kh = k[:, lo:lo + d_head]
        vh = v[:, lo:lo + d_head]
        # scale * (q @ k^T) in f32 (reference applies scale to q; mathematically identical)
        s = lax.dot_general(qh, kh, (((1,), (1,)), ((), ())),
                            preferred_element_type=jnp.float32) * scale   # (tq, tkv)
        m_prev = m_sc[:, h:h + 1]
        m_new = jnp.maximum(m_prev, jnp.max(s, axis=-1, keepdims=True))
        alpha = jnp.exp(m_prev - m_new)
        p = jnp.exp(s - m_new)
        l_sc[:, h:h + 1] = alpha * l_sc[:, h:h + 1] + jnp.sum(p, axis=-1, keepdims=True)
        acc_sc[:, lo:lo + d_head] = (
            alpha * acc_sc[:, lo:lo + d_head]
            + jnp.dot(p.astype(v.dtype), vh, preferred_element_type=jnp.float32))
        m_sc[:, h:h + 1] = m_new

    @pl.when(ki == pl.num_programs(2) - 1)
    def _():
        for h in range(n_head):                               # exact softmax normalization
            lo = h * d_head
            acc_sc[:, lo:lo + d_head] = acc_sc[:, lo:lo + d_head] / l_sc[:, h:h + 1]
        o_ref[0] = acc_sc[...].astype(o_ref.dtype)            # single lane-dense (tq, D) store


def flash_mha(q, k, v, n_head):
    """q: (B, Sq, D) bf16; k, v: (B, Skv, D) bf16 -> (B, Sq, D) bf16."""
    B, Sq, D = q.shape
    _, Skv, _ = k.shape
    d_head = D // n_head
    tq, tkv = _tile(Sq, _TQ), _tile(Skv, _TKV)
    kern = functools.partial(_flash_mha_kernel, n_head=n_head, d_head=d_head,
                             scale=d_head ** (-0.5))
    return pl.pallas_call(
        kern,
        out_shape=jax.ShapeDtypeStruct((B, Sq, D), jnp.bfloat16),
        grid_spec=pltpu.PrefetchScalarGridSpec(
            num_scalar_prefetch=0,
            grid=(B, Sq // tq, Skv // tkv),
            in_specs=[
                pl.BlockSpec((1, tq, D), lambda b, qi, ki: (b, qi, 0)),
                pl.BlockSpec((1, tkv, D), lambda b, qi, ki: (b, ki, 0)),
                pl.BlockSpec((1, tkv, D), lambda b, qi, ki: (b, ki, 0)),
            ],
            out_specs=pl.BlockSpec((1, tq, D), lambda b, qi, ki: (b, qi, 0)),
            scratch_shapes=[
                pltpu.VMEM((tq, n_head), jnp.float32),   # m (running max, one column per head)
                pltpu.VMEM((tq, n_head), jnp.float32),   # l (running denom)
                pltpu.VMEM((tq, D), jnp.float32),        # acc (un-normalized output)
            ],
        ),
        compiler_params=pltpu.CompilerParams(
            dimension_semantics=("parallel", "parallel", "arbitrary"),
            vmem_limit_bytes=_VMEM_LIMIT),
        cost_estimate=pl.CostEstimate(
            flops=4 * B * Sq * Skv * D,
            transcendentals=B * n_head * Sq * Skv,
            bytes_accessed=2 * (2 * B * Sq * D + 2 * B * Skv * D)),
    )(q, k, v)


# ----------------------------------------------------------------------------
# Module-level glue (reshapes / cheap slices only — no head transposes)
# ----------------------------------------------------------------------------

def self_attention_block(x, p, n_head, gamma, beta):
    """LayerNorm(x + SelfMHA(x)): fused QKV projection, fused Wo + residual + LN."""
    B, S, D = x.shape
    x2d = x.reshape(B * S, D)
    qkv = matmul(x2d, p["wqkv"], out_dtype=jnp.bfloat16).reshape(B, S, 3 * D)
    q, k, v = qkv[..., :D], qkv[..., D:2 * D], qkv[..., 2 * D:]
    attn = flash_mha(q, k, v, n_head)
    out = matmul_residual_layernorm(attn.reshape(B * S, D), p["wo"], x2d, gamma, beta)
    return out.reshape(B, S, D)


def cross_attention_block(x, memory, p, n_head, gamma, beta):
    """LayerNorm(x + CrossMHA(x, memory)): fused KV projection, fused Wo + residual + LN."""
    B, S, D = x.shape
    Sm = memory.shape[1]
    x2d = x.reshape(B * S, D)
    q = matmul(x2d, p["wq"], out_dtype=jnp.bfloat16).reshape(B, S, D)
    kv = matmul(memory.reshape(B * Sm, D), p["wkv"],
                out_dtype=jnp.bfloat16).reshape(B, Sm, 2 * D)
    k, v = kv[..., :D], kv[..., D:]
    attn = flash_mha(q, k, v, n_head)
    out = matmul_residual_layernorm(attn.reshape(B * S, D), p["wo"], x2d, gamma, beta)
    return out.reshape(B, S, D)


def decoder_layer(tgt, memory, p, n_head):
    B, S, D = tgt.shape
    # All masks are None in this demo: masking and the optional second self-attention pass
    # of the reference are skipped (reference default path).
    sa = self_attention_block(tgt, p["self_attn"], n_head, p["ln0_g"], p["ln0_b"])
    ca = cross_attention_block(sa, memory, p["cross_attn"], n_head, p["ln1_g"], p["ln1_b"])
    out = ffn_residual_layernorm(ca.reshape(B * S, D), p["ffn_w1"], p["ffn_w2"],
                                 p["ln2_g"], p["ln2_b"])
    return out.reshape(B, S, D)     # dropout = eval-mode identity


def decoder_forward(x, memory, params, n_head):
    out = x
    for p in params:
        out = decoder_layer(out, memory, p, n_head)
    # NOTE: the reference Decoder.forward returns `x`, not `out` (source bug) — reproduced
    # exactly.  `out` is returned alongside only so the kernels actually execute.
    return x, out


# ----------------------------------------------------------------------------
# Deterministic parameter initialization (weights pre-transposed, pre-fused, bf16)
# ----------------------------------------------------------------------------

def init_params(key, d_model, n_head, d_ff, n_layer):
    params = []
    for _ in range(n_layer):
        keys = jax.random.split(key, 11)
        key = keys[0]
        std = 1.0 / math.sqrt(d_model)

        def w(k, shape):
            return (jax.random.normal(k, shape, dtype=jnp.float32) * std).astype(jnp.bfloat16)

        sa_wq, sa_wk, sa_wv = (w(keys[1], (d_model, d_model)),
                               w(keys[2], (d_model, d_model)),
                               w(keys[3], (d_model, d_model)))
        ca_wq, ca_wk, ca_wv = (w(keys[5], (d_model, d_model)),
                               w(keys[6], (d_model, d_model)),
                               w(keys[7], (d_model, d_model)))
        layer = {
            "self_attn": {
                "wqkv": jnp.concatenate([sa_wq, sa_wk, sa_wv], axis=1),   # fused QKV (D, 3D)
                "wo": w(keys[4], (d_model, d_model)),
            },
            "cross_attn": {
                "wq": ca_wq,
                "wkv": jnp.concatenate([ca_wk, ca_wv], axis=1),           # fused KV (D, 2D)
                "wo": w(keys[8], (d_model, d_model)),
            },
            "ffn_w1": w(keys[9], (d_model, d_ff)),
            "ffn_w2": w(keys[10], (d_ff, d_model)),
            "ln0_g": jnp.ones((1, d_model), jnp.float32),
            "ln0_b": jnp.zeros((1, d_model), jnp.float32),
            "ln1_g": jnp.ones((1, d_model), jnp.float32),
            "ln1_b": jnp.zeros((1, d_model), jnp.float32),
            "ln2_g": jnp.ones((1, d_model), jnp.float32),
            "ln2_b": jnp.zeros((1, d_model), jnp.float32),
        }
        params.append(layer)
    return params


# ----------------------------------------------------------------------------
# Demo
# ----------------------------------------------------------------------------

if __name__ == "__main__":
    batch, seq, mem_seq = 2, 8, 8
    d_model, n_head, d_ff, n_layer = 32, 4, 64, 2

    key = jax.random.PRNGKey(0)
    kx, kmem, kp = jax.random.split(key, 3)
    x = jax.random.normal(kx, (batch, seq, d_model), dtype=jnp.float32)
    memory = jax.random.normal(kmem, (batch, mem_seq, d_model), dtype=jnp.float32)
    params = init_params(kp, d_model, n_head, d_ff, n_layer)

    fwd = jax.jit(functools.partial(decoder_forward, n_head=n_head))
    result, layers_out = fwd(x, memory, params)
    jax.block_until_ready(result)
    jax.block_until_ready(layers_out)

    assert result.shape == (batch, seq, d_model)
    assert layers_out.shape == (batch, seq, d_model)
    # Reference semantics: Decoder.forward returns its input `x` unchanged (source bug).
    assert bool(jnp.allclose(result, x))
    assert bool(jnp.all(jnp.isfinite(layers_out)))

    print("KERNEL_OK")
</pallas_src>

<mosaic_0001>
module attributes {stable_mosaic.version = 11 : i64} {
  func.func @_matmul_kernel(%arg0: i32, %arg1: i32, %arg2: i32, %arg3: memref<16x32xf32, #tpu.memory_space<vmem>>, %arg4: memref<32x96xbf16, #tpu.memory_space<vmem>>, %arg5: memref<16x96xbf16, #tpu.memory_space<vmem>>, %arg6: memref<16x96xf32, #tpu.memory_space<vmem>>) attributes {dimension_semantics = [#tpu.dimension_semantics<parallel>, #tpu.dimension_semantics<parallel>, #tpu.dimension_semantics<arbitrary>], iteration_bounds = array<i64: 1, 1, 1>, scalar_prefetch = 0 : i64, scratch_operands = 1 : i64, tpu.core_type = #tpu.core_type<tc>, window_params = [{transform_indices = @transform_0, window_bounds = array<i64: 16, 32>}, {transform_indices = @transform_1, window_bounds = array<i64: 32, 96>}, {transform_indices = @transform_2, window_bounds = array<i64: 16, 96>}]} {
    %c0_i32 = arith.constant 0 : i32
    %0 = arith.cmpi eq, %arg2, %c0_i32 : i32
    %1 = arith.extui %0 : i1 to i32
    %c0_i32_0 = arith.constant 0 : i32
    %2 = arith.cmpi ne, %1, %c0_i32_0 : i32
    scf.if %2 {
      %cst_10 = arith.constant 0.000000e+00 : f32
      %13 = vector.broadcast %cst_10 : f32 to vector<16x96xf32>
      %c0_11 = arith.constant 0 : index
      %c0_12 = arith.constant 0 : index
      %14 = vector.load %arg6[%c0_11, %c0_12] : memref<16x96xf32, #tpu.memory_space<vmem>>, vector<16x96xf32>
      tpu.vector_store %arg6[%c0_11, %c0_12], %13 {strides = array<i32>} : memref<16x96xf32, #tpu.memory_space<vmem>>, vector<16x96xf32>,
    } else {
    }
    %c0 = arith.constant 0 : index
    %c0_1 = arith.constant 0 : index
    %3 = vector.load %arg6[%c0, %c0_1] : memref<16x96xf32, #tpu.memory_space<vmem>>, vector<16x96xf32>
    %c0_2 = arith.constant 0 : index
    %c0_3 = arith.constant 0 : index
    %4 = vector.load %arg3[%c0_2, %c0_3] : memref<16x32xf32, #tpu.memory_space<vmem>>, vector<16x32xf32>
    %5 = arith.truncf %4 : vector<16x32xf32> to vector<16x32xbf16>
    %c0_4 = arith.constant 0 : index
    %c0_5 = arith.constant 0 : index
    %6 = vector.load %arg4[%c0_4, %c0_5] : memref<32x96xbf16, #tpu.memory_space<vmem>>, vector<32x96xbf16>
    %cst = arith.constant dense<0.000000e+00> : vector<16x96xf32>
    %7 = tpu.matmul %5, %6, %cst {dimension_numbers = #tpu.dot_dimension_numbers<[1], [0], [0], [1], [0, 0, 1, 1], [], []>} : vector<16x32xbf16>, vector<32x96xbf16>, vector<16x96xf32> -> vector<16x96xf32>
    %8 = arith.addf %3, %7 : vector<16x96xf32>
    %c0_6 = arith.constant 0 : index
    %c0_7 = arith.constant 0 : index
    %9 = vector.load %arg6[%c0_6, %c0_7] : memref<16x96xf32, #tpu.memory_space<vmem>>, vector<16x96xf32>
    tpu.vector_store %arg6[%c0_6, %c0_7], %8 {strides = array<i32>} : memref<16x96xf32, #tpu.memory_space<vmem>>, vector<16x96xf32>,
    %c0_i32_8 = arith.constant 0 : i32
    %10 = arith.cmpi eq, %arg2, %c0_i32_8 : i32
    %11 = arith.extui %10 : i1 to i32
    %c0_i32_9 = arith.constant 0 : i32
    %12 = arith.cmpi ne, %11, %c0_i32_9 : i32
    scf.if %12 {
      %c0_10 = arith.constant 0 : index
      %c0_11 = arith.constant 0 : index
      %13 = vector.load %arg6[%c0_10, %c0_11] : memref<16x96xf32, #tpu.memory_space<vmem>>, vector<16x96xf32>
      %14 = arith.truncf %13 : vector<16x96xf32> to vector<16x96xbf16>
      %c0_12 = arith.constant 0 : index
      %c0_13 = arith.constant 0 : index
      %15 = vector.load %arg5[%c0_12, %c0_13] : memref<16x96xbf16, #tpu.memory_space<vmem>>, vector<16x96xbf16>
      tpu.vector_store %arg5[%c0_12, %c0_13], %14 {strides = array<i32>} : memref<16x96xbf16, #tpu.memory_space<vmem>>, vector<16x96xbf16>,
    } else {
    }
    return
  }
  func.func @transform_0(%arg0: i32, %arg1: i32, %arg2: i32) -> (i32, i32) {
    %c0_i32 = arith.constant 0 : i32
    return %arg0, %arg2 : i32, i32
  }
  func.func @transform_1(%arg0: i32, %arg1: i32, %arg2: i32) -> (i32, i32) {
    %c0_i32 = arith.constant 0 : i32
    return %arg2, %arg1 : i32, i32
  }
  func.func @transform_2(%arg0: i32, %arg1: i32, %arg2: i32) -> (i32, i32) {
    %c0_i32 = arith.constant 0 : i32
    return %arg0, %arg1 : i32, i32
  }
}

module attributes {stable_mosaic.version = 11 : i64} {
  func.func @_matmul_res_ln_kernel(%arg0: i32, %arg1: i32, %arg2: memref<16x32xbf16, #tpu.memory_space<vmem>>, %arg3: memref<32x32xbf16, #tpu.memory_space<vmem>>, %arg4: memref<16x32xf32, #tpu.memory_space<vmem>>, %arg5: memref<1x32xf32, #tpu.memory_space<vmem>>, %arg6: memref<1x32xf32, #tpu.memory_space<vmem>>, %arg7: memref<16x32xf32, #tpu.memory_space<vmem>>, %arg8: memref<16x32xf32, #tpu.memory_space<vmem>>) attributes {dimension_semantics = [#tpu.dimension_semantics<parallel>, #tpu.dimension_semantics<arbitrary>], iteration_bounds = array<i64: 1, 1>, scalar_prefetch = 0 : i64, scratch_operands = 1 : i64, tpu.core_type = #tpu.core_type<tc>, window_params = [{transform_indices = @transform_0, window_bounds = array<i64: 16, 32>}, {transform_indices = @transform_1, window_bounds = array<i64: 32, 32>}, {transform_indices = @transform_2, window_bounds = array<i64: 16, 32>}, {pipeline_mode = #tpu.pipeline_mode<synchronous>, transform_indices = @transform_3, window_bounds = array<i64: 1, 32>}, {pipeline_mode = #tpu.pipeline_mode<synchronous>, transform_indices = @transform_4, window_bounds = array<i64: 1, 32>}, {transform_indices = @transform_5, window_bounds = array<i64: 16, 32>}]} {
    %c0_i32 = arith.constant 0 : i32
    %0 = arith.cmpi eq, %arg1, %c0_i32 : i32
    %1 = arith.extui %0 : i1 to i32
    %c0_i32_0 = arith.constant 0 : i32
    %2 = arith.cmpi ne, %1, %c0_i32_0 : i32
    scf.if %2 {
      %cst_10 = arith.constant 0.000000e+00 : f32
      %12 = vector.broadcast %cst_10 : f32 to vector<16x32xf32>
      %c0_11 = arith.constant 0 : index
      %c0_12 = arith.constant 0 : index
      %13 = vector.load %arg8[%c0_11, %c0_12] : memref<16x32xf32, #tpu.memory_space<vmem>>, vector<16x32xf32>
      tpu.vector_store %arg8[%c0_11, %c0_12], %12 {strides = array<i32>} : memref<16x32xf32, #tpu.memory_space<vmem>>, vector<16x32xf32>,
    } else {
    }
    %c0 = arith.constant 0 : index
    %c0_1 = arith.constant 0 : index
    %3 = vector.load %arg8[%c0, %c0_1] : memref<16x32xf32, #tpu.memory_space<vmem>>, vector<16x32xf32>
    %c0_2 = arith.constant 0 : index
    %c0_3 = arith.constant 0 : index
    %4 = vector.load %arg2[%c0_2, %c0_3] : memref<16x32xbf16, #tpu.memory_space<vmem>>, vector<16x32xbf16>
    %c0_4 = arith.constant 0 : index
    %c0_5 = arith.constant 0 : index
    %5 = vector.load %arg3[%c0_4, %c0_5] : memref<32x32xbf16, #tpu.memory_space<vmem>>, vector<32x32xbf16>
    %cst = arith.constant dense<0.000000e+00> : vector<16x32xf32>
    %6 = tpu.matmul %4, %5, %cst {dimension_numbers = #tpu.dot_dimension_numbers<[1], [0], [0], [1], [0, 0, 1, 1], [], []>} : vector<16x32xbf16>, vector<32x32xbf16>, vector<16x32xf32> -> vector<16x32xf32>
    %7 = arith.addf %3, %6 : vector<16x32xf32>
    %c0_6 = arith.constant 0 : index
    %c0_7 = arith.constant 0 : index
    %8 = vector.load %arg8[%c0_6, %c0_7] : memref<16x32xf32, #tpu.memory_space<vmem>>, vector<16x32xf32>
    tpu.vector_store %arg8[%c0_6, %c0_7], %7 {strides = array<i32>} : memref<16x32xf32, #tpu.memory_space<vmem>>, vector<16x32xf32>,
    %c0_i32_8 = arith.constant 0 : i32
    %9 = arith.cmpi eq, %arg1, %c0_i32_8 : i32
    %10 = arith.extui %9 : i1 to i32
    %c0_i32_9 = arith.constant 0 : i32
    %11 = arith.cmpi ne, %10, %c0_i32_9 : i32
    scf.if %11 {
      %c0_10 = arith.constant 0 : index
      %c0_11 = arith.constant 0 : index
      %12 = vector.load %arg8[%c0_10, %c0_11] : memref<16x32xf32, #tpu.memory_space<vmem>>, vector<16x32xf32>
      %c0_12 = arith.constant 0 : index
      %c0_13 = arith.constant 0 : index
      %13 = vector.load %arg4[%c0_12, %c0_13] : memref<16x32xf32, #tpu.memory_space<vmem>>, vector<16x32xf32>
      %14 = arith.addf %12, %13 : vector<16x32xf32>
      %cst_14 = arith.constant dense<0.000000e+00> : vector<16xf32>
      %15 = vector.multi_reduction <add>, %14, %cst_14 [1] : vector<16x32xf32> to vector<16xf32>
      %16 = vector.shape_cast %15 : vector<16xf32> to vector<16x1xf32>
      %cst_15 = arith.constant 3.200000e+01 : f32
      %17 = vector.broadcast %cst_15 : f32 to vector<16x1xf32>
      %18 = arith.divf %16, %17 : vector<16x1xf32>
      %19 = vector.broadcast %18 : vector<16x1xf32> to vector<16x32xf32>
      %20 = arith.subf %14, %19 : vector<16x32xf32>
      %21 = arith.mulf %20, %20 : vector<16x32xf32>
      %cst_16 = arith.constant dense<0.000000e+00> : vector<16xf32>
      %22 = vector.multi_reduction <add>, %21, %cst_16 [1] : vector<16x32xf32> to vector<16xf32>
      %23 = vector.shape_cast %22 : vector<16xf32> to vector<16x1xf32>
      %cst_17 = arith.constant 3.200000e+01 : f32
      %24 = vector.broadcast %cst_17 : f32 to vector<16x1xf32>
      %25 = arith.divf %23, %24 : vector<16x1xf32>
      %cst_18 = arith.constant 9.99999974E-6 : f32
      %26 = vector.broadcast %cst_18 : f32 to vector<16x1xf32>
      %27 = arith.addf %25, %26 : vector<16x1xf32>
      %28 = math.rsqrt %27 : vector<16x1xf32>
      %29 = vector.broadcast %28 : vector<16x1xf32> to vector<16x32xf32>
      %30 = arith.mulf %20, %29 : vector<16x32xf32>
      %c0_19 = arith.constant 0 : index
      %c0_20 = arith.constant 0 : index
      %31 = vector.load %arg5[%c0_19, %c0_20] : memref<1x32xf32, #tpu.memory_space<vmem>>, vector<1x32xf32>
      %32 = vector.broadcast %31 : vector<1x32xf32> to vector<16x32xf32>
      %33 = arith.mulf %30, %32 : vector<16x32xf32>
      %c0_21 = arith.constant 0 : index
      %c0_22 = arith.constant 0 : index
      %34 = vector.load %arg6[%c0_21, %c0_22] : memref<1x32xf32, #tpu.memory_space<vmem>>, vector<1x32xf32>
      %35 = vector.broadcast %34 : vector<1x32xf32> to vector<16x32xf32>
      %36 = arith.addf %33, %35 : vector<16x32xf32>
      %c0_23 = arith.constant 0 : index
      %c0_24 = arith.constant 0 : index
      %37 = vector.load %arg7[%c0_23, %c0_24] : memref<16x32xf32, #tpu.memory_space<vmem>>, vector<16x32xf32>
      tpu.vector_store %arg7[%c0_23, %c0_24], %36 {strides = array<i32>} : memref<16x32xf32, #tpu.memory_space<vmem>>, vector<16x32xf32>,
    } else {
    }
    return
  }
  func.func @transform_0(%arg0: i32, %arg1: i32) -> (i32, i32) {
    %c0_i32 = arith.constant 0 : i32
    return %arg0, %arg1 : i32, i32
  }
  func.func @transform_1(%arg0: i32, %arg1: i32) -> (i32, i32) {
    %c0_i32 = arith.constant 0 : i32
    %c0_i32_0 = arith.constant 0 : i32
    return %arg1, %c0_i32 : i32, i32
  }
  func.func @transform_2(%arg0: i32, %arg1: i32) -> (i32, i32) {
    %c0_i32 = arith.constant 0 : i32
    %c0_i32_0 = arith.constant 0 : i32
    return %arg0, %c0_i32 : i32, i32
  }
  func.func @transform_3(%arg0: i32, %arg1: i32) -> (i32, i32) {
    %c0_i32 = arith.constant 0 : i32
    %c0_i32_0 = arith.constant 0 : i32
    %c0_i32_1 = arith.constant 0 : i32
    return %c0_i32, %c0_i32_0 : i32, i32
  }
  func.func @transform_4(%arg0: i32, %arg1: i32) -> (i32, i32) {
    %c0_i32 = arith.constant 0 : i32
    %c0_i32_0 = arith.constant 0 : i32
    %c0_i32_1 = arith.constant 0 : i32
    return %c0_i32, %c0_i32_0 : i32, i32
  }
  func.func @transform_5(%arg0: i32, %arg1: i32) -> (i32, i32) {
    %c0_i32 = arith.constant 0 : i32
    %c0_i32_0 = arith.constant 0 : i32
    return %arg0, %c0_i32 : i32, i32
  }
}

module attributes {stable_mosaic.version = 11 : i64} {
  func.func @_flash_mha_kernel(%arg0: i32, %arg1: i32, %arg2: i32, %arg3: memref<1x8x32xbf16, #tpu.memory_space<vmem>>, %arg4: memref<1x8x32xbf16, #tpu.memory_space<vmem>>, %arg5: memref<1x8x32xbf16, #tpu.memory_space<vmem>>, %arg6: memref<1x8x32xbf16, #tpu.memory_space<vmem>>, %arg7: memref<8x4xf32, #tpu.memory_space<vmem>>, %arg8: memref<8x4xf32, #tpu.memory_space<vmem>>, %arg9: memref<8x32xf32, #tpu.memory_space<vmem>>) attributes {dimension_semantics = [#tpu.dimension_semantics<parallel>, #tpu.dimension_semantics<parallel>, #tpu.dimension_semantics<arbitrary>], iteration_bounds = array<i64: 2, 1, 1>, scalar_prefetch = 0 : i64, scratch_operands = 3 : i64, tpu.core_type = #tpu.core_type<tc>, window_params = [{transform_indices = @transform_0, window_bounds = array<i64: 1, 8, 32>}, {transform_indices = @transform_1, window_bounds = array<i64: 1, 8, 32>}, {transform_indices = @transform_2, window_bounds = array<i64: 1, 8, 32>}, {transform_indices = @transform_3, window_bounds = array<i64: 1, 8, 32>}]} {
    %c0_i32 = arith.constant 0 : i32
    %0 = arith.cmpi eq, %arg2, %c0_i32 : i32
    %1 = arith.extui %0 : i1 to i32
    %c0_i32_0 = arith.constant 0 : i32
    %2 = arith.cmpi ne, %1, %c0_i32_0 : i32
    scf.if %2 {
      %cst_72 = arith.constant 0xFF800000 : f32
      %128 = vector.broadcast %cst_72 : f32 to vector<8x4xf32>
      %c0_73 = arith.constant 0 : index
      %c0_74 = arith.constant 0 : index
      %129 = vector.load %arg7[%c0_73, %c0_74] : memref<8x4xf32, #tpu.memory_space<vmem>>, vector<8x4xf32>
      tpu.vector_store %arg7[%c0_73, %c0_74], %128 {strides = array<i32>} : memref<8x4xf32, #tpu.memory_space<vmem>>, vector<8x4xf32>,
      %cst_75 = arith.constant 0.000000e+00 : f32
      %130 = vector.broadcast %cst_75 : f32 to vector<8x4xf32>
      %c0_76 = arith.constant 0 : index
      %c0_77 = arith.constant 0 : index
      %131 = vector.load %arg8[%c0_76, %c0_77] : memref<8x4xf32, #tpu.memory_space<vmem>>, vector<8x4xf32>
      tpu.vector_store %arg8[%c0_76, %c0_77], %130 {strides = array<i32>} : memref<8x4xf32, #tpu.memory_space<vmem>>, vector<8x4xf32>,
      %cst_78 = arith.constant 0.000000e+00 : f32
      %132 = vector.broadcast %cst_78 : f32 to vector<8x32xf32>
      %c0_79 = arith.constant 0 : index
      %c0_80 = arith.constant 0 : index
      %133 = vector.load %arg9[%c0_79, %c0_80] : memref<8x32xf32, #tpu.memory_space<vmem>>, vector<8x32xf32>
      tpu.vector_store %arg9[%c0_79, %c0_80], %132 {strides = array<i32>} : memref<8x32xf32, #tpu.memory_space<vmem>>, vector<8x32xf32>,
    } else {
    }
    %c0 = arith.constant 0 : index
    %c0_1 = arith.constant 0 : index
    %c0_2 = arith.constant 0 : index
    %3 = vector.load %arg3[%c0, %c0_1, %c0_2] : memref<1x8x32xbf16, #tpu.memory_space<vmem>>, vector<1x8x32xbf16>
    %4 = vector.shape_cast %3 : vector<1x8x32xbf16> to vector<8x32xbf16>
    %c0_3 = arith.constant 0 : index
    %c0_4 = arith.constant 0 : index
    %c0_5 = arith.constant 0 : index
    %5 = vector.load %arg4[%c0_3, %c0_4, %c0_5] : memref<1x8x32xbf16, #tpu.memory_space<vmem>>, vector<1x8x32xbf16>
    %6 = vector.shape_cast %5 : vector<1x8x32xbf16> to vector<8x32xbf16>
    %c0_6 = arith.constant 0 : index
    %c0_7 = arith.constant 0 : index
    %c0_8 = arith.constant 0 : index
    %7 = vector.load %arg5[%c0_6, %c0_7, %c0_8] : memref<1x8x32xbf16, #tpu.memory_space<vmem>>, vector<1x8x32xbf16>
    %8 = vector.shape_cast %7 : vector<1x8x32xbf16> to vector<8x32xbf16>
    %9 = vector.extract_strided_slice %4 {offsets = [0, 0], sizes = [8, 8], strides = [1, 1]} : vector<8x32xbf16> to vector<8x8xbf16>
    %10 = vector.extract_strided_slice %6 {offsets = [0, 0], sizes = [8, 8], strides = [1, 1]} : vector<8x32xbf16> to vector<8x8xbf16>
    %11 = vector.extract_strided_slice %8 {offsets = [0, 0], sizes = [8, 8], strides = [1, 1]} : vector<8x32xbf16> to vector<8x8xbf16>
    %cst = arith.constant dense<0.000000e+00> : vector<8x8xf32>
    %12 = tpu.matmul %9, %10, %cst {dimension_numbers = #tpu.dot_dimension_numbers<[1], [1], [0], [0], [0, 0, 1, 0], [], []>} : vector<8x8xbf16>, vector<8x8xbf16>, vector<8x8xf32> -> vector<8x8xf32>
    %cst_9 = arith.constant 0.353553385 : f32
    %13 = vector.broadcast %cst_9 : f32 to vector<8x8xf32>
    %14 = arith.mulf %12, %13 : vector<8x8xf32>
    %c0_10 = arith.constant 0 : index
    %c0_11 = arith.constant 0 : index
    %15 = vector.load %arg7[%c0_10, %c0_11] : memref<8x4xf32, #tpu.memory_space<vmem>>, vector<8x1xf32>
    %cst_12 = arith.constant dense<0xFF800000> : vector<8xf32>
    %16 = vector.multi_reduction <maximumf>, %14, %cst_12 [1] : vector<8x8xf32> to vector<8xf32>
    %17 = vector.shape_cast %16 : vector<8xf32> to vector<8x1xf32>
    %18 = arith.maximumf %15, %17 : vector<8x1xf32>
    %19 = arith.subf %15, %18 : vector<8x1xf32>
    %20 = math.exp %19 : vector<8x1xf32>
    %21 = vector.broadcast %18 : vector<8x1xf32> to vector<8x8xf32>
    %22 = arith.subf %14, %21 : vector<8x8xf32>
    %23 = math.exp %22 : vector<8x8xf32>
    %c0_13 = arith.constant 0 : index
    %c0_14 = arith.constant 0 : index
    %24 = vector.load %arg8[%c0_13, %c0_14] : memref<8x4xf32, #tpu.memory_space<vmem>>, vector<8x1xf32>
    %25 = arith.mulf %20, %24 : vector<8x1xf32>
    %cst_15 = arith.constant dense<0.000000e+00> : vector<8xf32>
    %26 = vector.multi_reduction <add>, %23, %cst_15 [1] : vector<8x8xf32> to vector<8xf32>
    %27 = vector.shape_cast %26 : vector<8xf32> to vector<8x1xf32>
    %28 = arith.addf %25, %27 : vector<8x1xf32>
    %c0_16 = arith.constant 0 : index
    %c0_17 = arith.constant 0 : index
    %29 = vector.load %arg8[%c0_16, %c0_17] : memref<8x4xf32, #tpu.memory_space<vmem>>, vector<8x1xf32>
    tpu.vector_store %arg8[%c0_16, %c0_17], %28 {strides = array<i32>} : memref<8x4xf32, #tpu.memory_space<vmem>>, vector<8x1xf32>,
    %c0_18 = arith.constant 0 : index
    %c0_19 = arith.constant 0 : index
    %30 = vector.load %arg9[%c0_18, %c0_19] : memref<8x32xf32, #tpu.memory_space<vmem>>, vector<8x8xf32>
    %31 = vector.broadcast %20 : vector<8x1xf32> to vector<8x8xf32>
    %32 = arith.mulf %31, %30 : vector<8x8xf32>
    %33 = arith.truncf %23 : vector<8x8xf32> to vector<8x8xbf16>
    %cst_20 = arith.constant dense<0.000000e+00> : vector<8x8xf32>
    %34 = tpu.matmul %33, %11, %cst_20 {dimension_numbers = #tpu.dot_dimension_numbers<[1], [0], [0], [1], [0, 0, 1, 1], [], []>} : vector<8x8xbf16>, vector<8x8xbf16>, vector<8x8xf32> -> vector<8x8xf32>
    %35 = arith.addf %32, %34 : vector<8x8xf32>
    %c0_21 = arith.constant 0 : index
    %c0_22 = arith.constant 0 : index
    %36 = vector.load %arg9[%c0_21, %c0_22] : memref<8x32xf32, #tpu.memory_space<vmem>>, vector<8x8xf32>
    tpu.vector_store %arg9[%c0_21, %c0_22], %35 {strides = array<i32>} : memref<8x32xf32, #tpu.memory_space<vmem>>, vector<8x8xf32>,
    %c0_23 = arith.constant 0 : index
    %c0_24 = arith.constant 0 : index
    %37 = vector.load %arg7[%c0_23, %c0_24] : memref<8x4xf32, #tpu.memory_space<vmem>>, vector<8x1xf32>
    tpu.vector_store %arg7[%c0_23, %c0_24], %18 {strides = array<i32>} : memref<8x4xf32, #tpu.memory_space<vmem>>, vector<8x1xf32>,
    %38 = vector.extract_strided_slice %4 {offsets = [0, 8], sizes = [8, 8], strides = [1, 1]} : vector<8x32xbf16> to vector<8x8xbf16>
    %39 = vector.extract_strided_slice %6 {offsets = [0, 8], sizes = [8, 8], strides = [1, 1]} : vector<8x32xbf16> to vector<8x8xbf16>
    %40 = vector.extract_strided_slice %8 {offsets = [0, 8], sizes = [8, 8], strides = [1, 1]} : vector<8x32xbf16> to vector<8x8xbf16>
    %cst_25 = arith.constant dense<0.000000e+00> : vector<8x8xf32>
    %41 = tpu.matmul %38, %39, %cst_25 {dimension_numbers = #tpu.dot_dimension_numbers<[1], [1], [0], [0], [0, 0, 1, 0], [], []>} : vector<8x8xbf16>, vector<8x8xbf16>, vector<8x8xf32> -> vector<8x8xf32>
    %cst_26 = arith.constant 0.353553385 : f32
    %42 = vector.broadcast %cst_26 : f32 to vector<8x8xf32>
    %43 = arith.mulf %41, %42 : vector<8x8xf32>
    %c0_27 = arith.constant 0 : index
    %c1 = arith.constant 1 : index
    %44 = vector.load %arg7[%c0_27, %c1] : memref<8x4xf32, #tpu.memory_space<vmem>>, vector<8x1xf32>
    %cst_28 = arith.constant dense<0xFF800000> : vector<8xf32>
    %45 = vector.multi_reduction <maximumf>, %43, %cst_28 [1] : vector<8x8xf32> to vector<8xf32>
    %46 = vector.shape_cast %45 : vector<8xf32> to vector<8x1xf32>
    %47 = arith.maximumf %44, %46 : vector<8x1xf32>
    %48 = arith.subf %44, %47 : vector<8x1xf32>
    %49 = math.exp %48 : vector<8x1xf32>
    %50 = vector.broadcast %47 : vector<8x1xf32> to vector<8x8xf32>
    %51 = arith.subf %43, %50 : vector<8x8xf32>
    %52 = math.exp %51 : vector<8x8xf32>
    %c0_29 = arith.constant 0 : index
    %c1_30 = arith.constant 1 : index
    %53 = vector.load %arg8[%c0_29, %c1_30] : memref<8x4xf32, #tpu.memory_space<vmem>>, vector<8x1xf32>
    %54 = arith.mulf %49, %53 : vector<8x1xf32>
    %cst_31 = arith.constant dense<0.000000e+00> : vector<8xf32>
    %55 = vector.multi_reduction <add>, %52, %cst_31 [1] : vector<8x8xf32> to vector<8xf32>
    %56 = vector.shape_cast %55 : vector<8xf32> to vector<8x1xf32>
    %57 = arith.addf %54, %56 : vector<8x1xf32>
    %c0_32 = arith.constant 0 : index
    %c1_33 = arith.constant 1 : index
    %58 = vector.load %arg8[%c0_32, %c1_33] : memref<8x4xf32, #tpu.memory_space<vmem>>, vector<8x1xf32>
    tpu.vector_store %arg8[%c0_32, %c1_33], %57 {strides = array<i32>} : memref<8x4xf32, #tpu.memory_space<vmem>>, vector<8x1xf32>,
    %c0_34 = arith.constant 0 : index
    %c8 = arith.constant 8 : index
    %59 = vector.load %arg9[%c0_34, %c8] : memref<8x32xf32, #tpu.memory_space<vmem>>, vector<8x8xf32>
    %60 = vector.broadcast %49 : vector<8x1xf32> to vector<8x8xf32>
    %61 = arith.mulf %60, %59 : vector<8x8xf32>
    %62 = arith.truncf %52 : vector<8x8xf32> to vector<8x8xbf16>
    %cst_35 = arith.constant dense<0.000000e+00> : vector<8x8xf32>
    %63 = tpu.matmul %62, %40, %cst_35 {dimension_numbers = #tpu.dot_dimension_numbers<[1], [0], [0], [1], [0, 0, 1, 1], [], []>} : vector<8x8xbf16>, vector<8x8xbf16>, vector<8x8xf32> -> vector<8x8xf32>
    %64 = arith.addf %61, %63 : vector<8x8xf32>
    %c0_36 = arith.constant 0 : index
    %c8_37 = arith.constant 8 : index
    %65 = vector.load %arg9[%c0_36, %c8_37] : memref<8x32xf32, #tpu.memory_space<vmem>>, vector<8x8xf32>
    tpu.vector_store %arg9[%c0_36, %c8_37], %64 {strides = array<i32>} : memref<8x32xf32, #tpu.memory_space<vmem>>, vector<8x8xf32>,
    %c0_38 = arith.constant 0 : index
    %c1_39 = arith.constant 1 : index
    %66 = vector.load %arg7[%c0_38, %c1_39] : memref<8x4xf32, #tpu.memory_space<vmem>>, vector<8x1xf32>
    tpu.vector_store %arg7[%c0_38, %c1_39], %47 {strides = array<i32>} : memref<8x4xf32, #tpu.memory_space<vmem>>, vector<8x1xf32>,
    %67 = vector.extract_strided_slice %4 {offsets = [0, 16], sizes = [8, 8], strides = [1, 1]} : vector<8x32xbf16> to vector<8x8xbf16>
    %68 = vector.extract_strided_slice %6 {offsets = [0, 16], sizes = [8, 8], strides = [1, 1]} : vector<8x32xbf16> to vector<8x8xbf16>
    %69 = vector.extract_strided_slice %8 {offsets = [0, 16], sizes = [8, 8], strides = [1, 1]} : vector<8x32xbf16> to vector<8x8xbf16>
    %cst_40 = arith.constant dense<0.000000e+00> : vector<8x8xf32>
    %70 = tpu.matmul %67, %68, %cst_40 {dimension_numbers = #tpu.dot_dimension_numbers<[1], [1], [0], [0], [0, 0, 1, 0], [], []>} : vector<8x8xbf16>, vector<8x8xbf16>, vector<8x8xf32> -> vector<8x8xf32>
    %cst_41 = arith.constant 0.353553385 : f32
    %71 = vector.broadcast %cst_41 : f32 to vector<8x8xf32>
    %72 = arith.mulf %70, %71 : vector<8x8xf32>
    %c0_42 = arith.constant 0 : index
    %c2 = arith.constant 2 : index
    %73 = vector.load %arg7[%c0_42, %c2] : memref<8x4xf32, #tpu.memory_space<vmem>>, vector<8x1xf32>
    %cst_43 = arith.constant dense<0xFF800000> : vector<8xf32>
    %74 = vector.multi_reduction <maximumf>, %72, %cst_43 [1] : vector<8x8xf32> to vector<8xf32>
    %75 = vector.shape_cast %74 : vector<8xf32> to vector<8x1xf32>
    %76 = arith.maximumf %73, %75 : vector<8x1xf32>
    %77 = arith.subf %73, %76 : vector<8x1xf32>
    %78 = math.exp %77 : vector<8x1xf32>
    %79 = vector.broadcast %76 : vector<8x1xf32> to vector<8x8xf32>
    %80 = arith.subf %72, %79 : vector<8x8xf32>
    %81 = math.exp %80 : vector<8x8xf32>
    %c0_44 = arith.constant 0 : index
    %c2_45 = arith.constant 2 : index
    %82 = vector.load %arg8[%c0_44, %c2_45] : memref<8x4xf32, #tpu.memory_space<vmem>>, vector<8x1xf32>
    %83 = arith.mulf %78, %82 : vector<8x1xf32>
    %cst_46 = arith.constant dense<0.000000e+00> : vector<8xf32>
    %84 = vector.multi_reduction <add>, %81, %cst_46 [1] : vector<8x8xf32> to vector<8xf32>
    %85 = vector.shape_cast %84 : vector<8xf32> to vector<8x1xf32>
    %86 = arith.addf %83, %85 : vector<8x1xf32>
    %c0_47 = arith.constant 0 : index
    %c2_48 = arith.constant 2 : index
    %87 = vector.load %arg8[%c0_47, %c2_48] : memref<8x4xf32, #tpu.memory_space<vmem>>, vector<8x1xf32>
    tpu.vector_store %arg8[%c0_47, %c2_48], %86 {strides = array<i32>} : memref<8x4xf32, #tpu.memory_space<vmem>>, vector<8x1xf32>,
    %c0_49 = arith.constant 0 : index
    %c16 = arith.constant 16 : index
    %88 = vector.load %arg9[%c0_49, %c16] : memref<8x32xf32, #tpu.memory_space<vmem>>, vector<8x8xf32>
    %89 = vector.broadcast %78 : vector<8x1xf32> to vector<8x8xf32>
    %90 = arith.mulf %89, %88 : vector<8x8xf32>
    %91 = arith.truncf %81 : vector<8x8xf32> to vector<8x8xbf16>
    %cst_50 = arith.constant dense<0.000000e+00> : vector<8x8xf32>
    %92 = tpu.matmul %91, %69, %cst_50 {dimension_numbers = #tpu.dot_dimension_numbers<[1], [0], [0], [1], [0, 0, 1, 1], [], []>} : vector<8x8xbf16>, vector<8x8xbf16>, vector<8x8xf32> -> vector<8x8xf32>
    %93 = arith.addf %90, %92 : vector<8x8xf32>
    %c0_51 = arith.constant 0 : index
    %c16_52 = arith.constant 16 : index
    %94 = vector.load %arg9[%c0_51, %c16_52] : memref<8x32xf32, #tpu.memory_space<vmem>>, vector<8x8xf32>
    tpu.vector_store %arg9[%c0_51, %c16_52], %93 {strides = array<i32>} : memref<8x32xf32, #tpu.memory_space<vmem>>, vector<8x8xf32>,
    %c0_53 = arith.constant 0 : index
    %c2_54 = arith.constant 2 : index
    %95 = vector.load %arg7[%c0_53, %c2_54] : memref<8x4xf32, #tpu.memory_space<vmem>>, vector<8x1xf32>
    tpu.vector_store %arg7[%c0_53, %c2_54], %76 {strides = array<i32>} : memref<8x4xf32, #tpu.memory_space<vmem>>, vector<8x1xf32>,
    %96 = vector.extract_strided_slice %4 {offsets = [0, 24], sizes = [8, 8], strides = [1, 1]} : vector<8x32xbf16> to vector<8x8xbf16>
    %97 = vector.extract_strided_slice %6 {offsets = [0, 24], sizes = [8, 8], strides = [1, 1]} : vector<8x32xbf16> to vector<8x8xbf16>
    %98 = vector.extract_strided_slice %8 {offsets = [0, 24], sizes = [8, 8], strides = [1, 1]} : vector<8x32xbf16> to vector<8x8xbf16>
    %cst_55 = arith.constant dense<0.000000e+00> : vector<8x8xf32>
    %99 = tpu.matmul %96, %97, %cst_55 {dimension_numbers = #tpu.dot_dimension_numbers<[1], [1], [0], [0], [0, 0, 1, 0], [], []>} : vector<8x8xbf16>, vector<8x8xbf16>, vector<8x8xf32> -> vector<8x8xf32>
    %cst_56 = arith.constant 0.353553385 : f32
    %100 = vector.broadcast %cst_56 : f32 to vector<8x8xf32>
    %101 = arith.mulf %99, %100 : vector<8x8xf32>
    %c0_57 = arith.constant 0 : index
    %c3 = arith.constant 3 : index
    %102 = vector.load %arg7[%c0_57, %c3] : memref<8x4xf32, #tpu.memory_space<vmem>>, vector<8x1xf32>
    %cst_58 = arith.constant dense<0xFF800000> : vector<8xf32>
    %103 = vector.multi_reduction <maximumf>, %101, %cst_58 [1] : vector<8x8xf32> to vector<8xf32>
    %104 = vector.shape_cast %103 : vector<8xf32> to vector<8x1xf32>
    %105 = arith.maximumf %102, %104 : vector<8x1xf32>
    %106 = arith.subf %102, %105 : vector<8x1xf32>
    %107 = math.exp %106 : vector<8x1xf32>
    %108 = vector.broadcast %105 : vector<8x1xf32> to vector<8x8xf32>
    %109 = arith.subf %101, %108 : vector<8x8xf32>
    %110 = math.exp %109 : vector<8x8xf32>
    %c0_59 = arith.constant 0 : index
    %c3_60 = arith.constant 3 : index
    %111 = vector.load %arg8[%c0_59, %c3_60] : memref<8x4xf32, #tpu.memory_space<vmem>>, vector<8x1xf32>
    %112 = arith.mulf %107, %111 : vector<8x1xf32>
    %cst_61 = arith.constant dense<0.000000e+00> : vector<8xf32>
    %113 = vector.multi_reduction <add>, %110, %cst_61 [1] : vector<8x8xf32> to vector<8xf32>
    %114 = vector.shape_cast %113 : vector<8xf32> to vector<8x1xf32>
    %115 = arith.addf %112, %114 : vector<8x1xf32>
    %c0_62 = arith.constant 0 : index
    %c3_63 = arith.constant 3 : index
    %116 = vector.load %arg8[%c0_62, %c3_63] : memref<8x4xf32, #tpu.memory_space<vmem>>, vector<8x1xf32>
    tpu.vector_store %arg8[%c0_62, %c3_63], %115 {strides = array<i32>} : memref<8x4xf32, #tpu.memory_space<vmem>>, vector<8x1xf32>,
    %c0_64 = arith.constant 0 : index
    %c24 = arith.constant 24 : index
    %117 = vector.load %arg9[%c0_64, %c24] : memref<8x32xf32, #tpu.memory_space<vmem>>, vector<8x8xf32>
    %118 = vector.broadcast %107 : vector<8x1xf32> to vector<8x8xf32>
    %119 = arith.mulf %118, %117 : vector<8x8xf32>
    %120 = arith.truncf %110 : vector<8x8xf32> to vector<8x8xbf16>
    %cst_65 = arith.constant dense<0.000000e+00> : vector<8x8xf32>
    %121 = tpu.matmul %120, %98, %cst_65 {dimension_numbers = #tpu.dot_dimension_numbers<[1], [0], [0], [1], [0, 0, 1, 1], [], []>} : vector<8x8xbf16>, vector<8x8xbf16>, vector<8x8xf32> -> vector<8x8xf32>
    %122 = arith.addf %119, %121 : vector<8x8xf32>
    %c0_66 = arith.constant 0 : index
    %c24_67 = arith.constant 24 : index
    %123 = vector.load %arg9[%c0_66, %c24_67] : memref<8x32xf32, #tpu.memory_space<vmem>>, vector<8x8xf32>
    tpu.vector_store %arg9[%c0_66, %c24_67], %122 {strides = array<i32>} : memref<8x32xf32, #tpu.memory_space<vmem>>, vector<8x8xf32>,
    %c0_68 = arith.constant 0 : index
    %c3_69 = arith.constant 3 : index
    %124 = vector.load %arg7[%c0_68, %c3_69] : memref<8x4xf32, #tpu.memory_space<vmem>>, vector<8x1xf32>
    tpu.vector_store %arg7[%c0_68, %c3_69], %105 {strides = array<i32>} : memref<8x4xf32, #tpu.memory_space<vmem>>, vector<8x1xf32>,
    %c0_i32_70 = arith.constant 0 : i32
    %125 = arith.cmpi eq, %arg2, %c0_i32_70 : i32
    %126 = arith.extui %125 : i1 to i32
    %c0_i32_71 = arith.constant 0 : i32
    %127 = arith.cmpi ne, %126, %c0_i32_71 : i32
    scf.if %127 {
      %c0_72 = arith.constant 0 : index
      %c0_73 = arith.constant 0 : index
      %128 = vector.load %arg9[%c0_72, %c0_73] : memref<8x32xf32, #tpu.memory_space<vmem>>, vector<8x8xf32>
      %c0_74 = arith.constant 0 : index
      %c0_75 = arith.constant 0 : index
      %129 = vector.load %arg8[%c0_74, %c0_75] : memref<8x4xf32, #tpu.memory_space<vmem>>, vector<8x1xf32>
      %130 = vector.broadcast %129 : vector<8x1xf32> to vector<8x8xf32>
      %131 = arith.divf %128, %130 : vector<8x8xf32>
      %c0_76 = arith.constant 0 : index
      %c0_77 = arith.constant 0 : index
      %132 = vector.load %arg9[%c0_76, %c0_77] : memref<8x32xf32, #tpu.memory_space<vmem>>, vector<8x8xf32>
      tpu.vector_store %arg9[%c0_76, %c0_77], %131 {strides = array<i32>} : memref<8x32xf32, #tpu.memory_space<vmem>>, vector<8x8xf32>,
      %c0_78 = arith.constant 0 : index
      %c8_79 = arith.constant 8 : index
      %133 = vector.load %arg9[%c0_78, %c8_79] : memref<8x32xf32, #tpu.memory_space<vmem>>, vector<8x8xf32>
      %c0_80 = arith.constant 0 : index
      %c1_81 = arith.constant 1 : index
      %134 = vector.load %arg8[%c0_80, %c1_81] : memref<8x4xf32, #tpu.memory_space<vmem>>, vector<8x1xf32>
      %135 = vector.broadcast %134 : vector<8x1xf32> to vector<8x8xf32>
      %136 = arith.divf %133, %135 : vector<8x8xf32>
      %c0_82 = arith.constant 0 : index
      %c8_83 = arith.constant 8 : index
      %137 = vector.load %arg9[%c0_82, %c8_83] : memref<8x32xf32, #tpu.memory_space<vmem>>, vector<8x8xf32>
      tpu.vector_store %arg9[%c0_82, %c8_83], %136 {strides = array<i32>} : memref<8x32xf32, #tpu.memory_space<vmem>>, vector<8x8xf32>,
      %c0_84 = arith.constant 0 : index
      %c16_85 = arith.constant 16 : index
      %138 = vector.load %arg9[%c0_84, %c16_85] : memref<8x32xf32, #tpu.memory_space<vmem>>, vector<8x8xf32>
      %c0_86 = arith.constant 0 : index
      %c2_87 = arith.constant 2 : index
      %139 = vector.load %arg8[%c0_86, %c2_87] : memref<8x4xf32, #tpu.memory_space<vmem>>, vector<8x1xf32>
      %140 = vector.broadcast %139 : vector<8x1xf32> to vector<8x8xf32>
      %141 = arith.divf %138, %140 : vector<8x8xf32>
      %c0_88 = arith.constant 0 : index
      %c16_89 = arith.constant 16 : index
      %142 = vector.load %arg9[%c0_88, %c16_89] : memref<8x32xf32, #tpu.memory_space<vmem>>, vector<8x8xf32>
      tpu.vector_store %arg9[%c0_88, %c16_89], %141 {strides = array<i32>} : memref<8x32xf32, #tpu.memory_space<vmem>>, vector<8x8xf32>,
      %c0_90 = arith.constant 0 : index
      %c24_91 = arith.constant 24 : index
      %143 = vector.load %arg9[%c0_90, %c24_91] : memref<8x32xf32, #tpu.memory_space<vmem>>, vector<8x8xf32>
      %c0_92 = arith.constant 0 : index
      %c3_93 = arith.constant 3 : index
      %144 = vector.load %arg8[%c0_92, %c3_93] : memref<8x4xf32, #tpu.memory_space<vmem>>, vector<8x1xf32>
      %145 = vector.broadcast %144 : vector<8x1xf32> to vector<8x8xf32>
      %146 = arith.divf %143, %145 : vector<8x8xf32>
      %c0_94 = arith.constant 0 : index
      %c24_95 = arith.constant 24 : index
      %147 = vector.load %arg9[%c0_94, %c24_95] : memref<8x32xf32, #tpu.memory_space<vmem>>, vector<8x8xf32>
      tpu.vector_store %arg9[%c0_94, %c24_95], %146 {strides = array<i32>} : memref<8x32xf32, #tpu.memory_space<vmem>>, vector<8x8xf32>,
      %c0_96 = arith.constant 0 : index
      %c0_97 = arith.constant 0 : index
      %148 = vector.load %arg9[%c0_96, %c0_97] : memref<8x32xf32, #tpu.memory_space<vmem>>, vector<8x32xf32>
      %149 = arith.truncf %148 : vector<8x32xf32> to vector<8x32xbf16>
      %c0_98 = arith.constant 0 : index
      %c0_99 = arith.constant 0 : index
      %c0_100 = arith.constant 0 : index
      %150 = vector.load %arg6[%c0_98, %c0_99, %c0_100] : memref<1x8x32xbf16, #tpu.memory_space<vmem>>, vector<1x8x32xbf16>
      %151 = vector.shape_cast %150 : vector<1x8x32xbf16> to vector<8x32xbf16>
      %152 = vector.shape_cast %149 : vector<8x32xbf16> to vector<1x8x32xbf16>
      tpu.vector_store %arg6[%c0_98, %c0_99, %c0_100], %152 {strides = array<i32>} : memref<1x8x32xbf16, #tpu.memory_space<vmem>>, vector<1x8x32xbf16>,
    } else {
    }
    return
  }
  func.func @transform_0(%arg0: i32, %arg1: i32, %arg2: i32) -> (i32, i32, i32) {
    %c0_i32 = arith.constant 0 : i32
    %c0_i32_0 = arith.constant 0 : i32
    return %arg0, %arg1, %c0_i32 : i32, i32, i32
  }
  func.func @transform_1(%arg0: i32, %arg1: i32, %arg2: i32) -> (i32, i32, i32) {
    %c0_i32 = arith.constant 0 : i32
    %c0_i32_0 = arith.constant 0 : i32
    return %arg0, %arg2, %c0_i32 : i32, i32, i32
  }
  func.func @transform_2(%arg0: i32, %arg1: i32, %arg2: i32) -> (i32, i32, i32) {
    %c0_i32 = arith.constant 0 : i32
    %c0_i32_0 = arith.constant 0 : i32
    return %arg0, %arg2, %c0_i32 : i32, i32, i32
  }
  func.func @transform_3(%arg0: i32, %arg1: i32, %arg2: i32) -> (i32, i32, i32) {
    %c0_i32 = arith.constant 0 : i32
    %c0_i32_0 = arith.constant 0 : i32
    return %arg0, %arg1, %c0_i32 : i32, i32, i32
  }
}

module attributes {stable_mosaic.version = 11 : i64} {
  func.func @_matmul_kernel(%arg0: i32, %arg1: i32, %arg2: i32, %arg3: memref<16x32xf32, #tpu.memory_space<vmem>>, %arg4: memref<32x32xbf16, #tpu.memory_space<vmem>>, %arg5: memref<16x32xbf16, #tpu.memory_space<vmem>>, %arg6: memref<16x32xf32, #tpu.memory_space<vmem>>) attributes {dimension_semantics = [#tpu.dimension_semantics<parallel>, #tpu.dimension_semantics<parallel>, #tpu.dimension_semantics<arbitrary>], iteration_bounds = array<i64: 1, 1, 1>, scalar_prefetch = 0 : i64, scratch_operands = 1 : i64, tpu.core_type = #tpu.core_type<tc>, window_params = [{transform_indices = @transform_0, window_bounds = array<i64: 16, 32>}, {transform_indices = @transform_1, window_bounds = array<i64: 32, 32>}, {transform_indices = @transform_2, window_bounds = array<i64: 16, 32>}]} {
    %c0_i32 = arith.constant 0 : i32
    %0 = arith.cmpi eq, %arg2, %c0_i32 : i32
    %1 = arith.extui %0 : i1 to i32
    %c0_i32_0 = arith.constant 0 : i32
    %2 = arith.cmpi ne, %1, %c0_i32_0 : i32
    scf.if %2 {
      %cst_10 = arith.constant 0.000000e+00 : f32
      %13 = vector.broadcast %cst_10 : f32 to vector<16x32xf32>
      %c0_11 = arith.constant 0 : index
      %c0_12 = arith.constant 0 : index
      %14 = vector.load %arg6[%c0_11, %c0_12] : memref<16x32xf32, #tpu.memory_space<vmem>>, vector<16x32xf32>
      tpu.vector_store %arg6[%c0_11, %c0_12], %13 {strides = array<i32>} : memref<16x32xf32, #tpu.memory_space<vmem>>, vector<16x32xf32>,
    } else {
    }
    %c0 = arith.constant 0 : index
    %c0_1 = arith.constant 0 : index
    %3 = vector.load %arg6[%c0, %c0_1] : memref<16x32xf32, #tpu.memory_space<vmem>>, vector<16x32xf32>
    %c0_2 = arith.constant 0 : index
    %c0_3 = arith.constant 0 : index
    %4 = vector.load %arg3[%c0_2, %c0_3] : memref<16x32xf32, #tpu.memory_space<vmem>>, vector<16x32xf32>
    %5 = arith.truncf %4 : vector<16x32xf32> to vector<16x32xbf16>
    %c0_4 = arith.constant 0 : index
    %c0_5 = arith.constant 0 : index
    %6 = vector.load %arg4[%c0_4, %c0_5] : memref<32x32xbf16, #tpu.memory_space<vmem>>, vector<32x32xbf16>
    %cst = arith.constant dense<0.000000e+00> : vector<16x32xf32>
    %7 = tpu.matmul %5, %6, %cst {dimension_numbers = #tpu.dot_dimension_numbers<[1], [0], [0], [1], [0, 0, 1, 1], [], []>} : vector<16x32xbf16>, vector<32x32xbf16>, vector<16x32xf32> -> vector<16x32xf32>
    %8 = arith.addf %3, %7 : vector<16x32xf32>
    %c0_6 = arith.constant 0 : index
    %c0_7 = arith.constant 0 : index
    %9 = vector.load %arg6[%c0_6, %c0_7] : memref<16x32xf32, #tpu.memory_space<vmem>>, vector<16x32xf32>
    tpu.vector_store %arg6[%c0_6, %c0_7], %8 {strides = array<i32>} : memref<16x32xf32, #tpu.memory_space<vmem>>, vector<16x32xf32>,
    %c0_i32_8 = arith.constant 0 : i32
    %10 = arith.cmpi eq, %arg2, %c0_i32_8 : i32
    %11 = arith.extui %10 : i1 to i32
    %c0_i32_9 = arith.constant 0 : i32
    %12 = arith.cmpi ne, %11, %c0_i32_9 : i32
    scf.if %12 {
      %c0_10 = arith.constant 0 : index
      %c0_11 = arith.constant 0 : index
      %13 = vector.load %arg6[%c0_10, %c0_11] : memref<16x32xf32, #tpu.memory_space<vmem>>, vector<16x32xf32>
      %14 = arith.truncf %13 : vector<16x32xf32> to vector<16x32xbf16>
      %c0_12 = arith.constant 0 : index
      %c0_13 = arith.constant 0 : index
      %15 = vector.load %arg5[%c0_12, %c0_13] : memref<16x32xbf16, #tpu.memory_space<vmem>>, vector<16x32xbf16>
      tpu.vector_store %arg5[%c0_12, %c0_13], %14 {strides = array<i32>} : memref<16x32xbf16, #tpu.memory_space<vmem>>, vector<16x32xbf16>,
    } else {
    }
    return
  }
  func.func @transform_0(%arg0: i32, %arg1: i32, %arg2: i32) -> (i32, i32) {
    %c0_i32 = arith.constant 0 : i32
    return %arg0, %arg2 : i32, i32
  }
  func.func @transform_1(%arg0: i32, %arg1: i32, %arg2: i32) -> (i32, i32) {
    %c0_i32 = arith.constant 0 : i32
    return %arg2, %arg1 : i32, i32
  }
  func.func @transform_2(%arg0: i32, %arg1: i32, %arg2: i32) -> (i32, i32) {
    %c0_i32 = arith.constant 0 : i32
    return %arg0, %arg1 : i32, i32
  }
}

module attributes {stable_mosaic.version = 11 : i64} {
  func.func @_matmul_kernel(%arg0: i32, %arg1: i32, %arg2: i32, %arg3: memref<16x32xf32, #tpu.memory_space<vmem>>, %arg4: memref<32x64xbf16, #tpu.memory_space<vmem>>, %arg5: memref<16x64xbf16, #tpu.memory_space<vmem>>, %arg6: memref<16x64xf32, #tpu.memory_space<vmem>>) attributes {dimension_semantics = [#tpu.dimension_semantics<parallel>, #tpu.dimension_semantics<parallel>, #tpu.dimension_semantics<arbitrary>], iteration_bounds = array<i64: 1, 1, 1>, scalar_prefetch = 0 : i64, scratch_operands = 1 : i64, tpu.core_type = #tpu.core_type<tc>, window_params = [{transform_indices = @transform_0, window_bounds = array<i64: 16, 32>}, {transform_indices = @transform_1, window_bounds = array<i64: 32, 64>}, {transform_indices = @transform_2, window_bounds = array<i64: 16, 64>}]} {
    %c0_i32 = arith.constant 0 : i32
    %0 = arith.cmpi eq, %arg2, %c0_i32 : i32
    %1 = arith.extui %0 : i1 to i32
    %c0_i32_0 = arith.constant 0 : i32
    %2 = arith.cmpi ne, %1, %c0_i32_0 : i32
    scf.if %2 {
      %cst_10 = arith.constant 0.000000e+00 : f32
      %13 = vector.broadcast %cst_10 : f32 to vector<16x64xf32>
      %c0_11 = arith.constant 0 : index
      %c0_12 = arith.constant 0 : index
      %14 = vector.load %arg6[%c0_11, %c0_12] : memref<16x64xf32, #tpu.memory_space<vmem>>, vector<16x64xf32>
      tpu.vector_store %arg6[%c0_11, %c0_12], %13 {strides = array<i32>} : memref<16x64xf32, #tpu.memory_space<vmem>>, vector<16x64xf32>,
    } else {
    }
    %c0 = arith.constant 0 : index
    %c0_1 = arith.constant 0 : index
    %3 = vector.load %arg6[%c0, %c0_1] : memref<16x64xf32, #tpu.memory_space<vmem>>, vector<16x64xf32>
    %c0_2 = arith.constant 0 : index
    %c0_3 = arith.constant 0 : index
    %4 = vector.load %arg3[%c0_2, %c0_3] : memref<16x32xf32, #tpu.memory_space<vmem>>, vector<16x32xf32>
    %5 = arith.truncf %4 : vector<16x32xf32> to vector<16x32xbf16>
    %c0_4 = arith.constant 0 : index
    %c0_5 = arith.constant 0 : index
    %6 = vector.load %arg4[%c0_4, %c0_5] : memref<32x64xbf16, #tpu.memory_space<vmem>>, vector<32x64xbf16>
    %cst = arith.constant dense<0.000000e+00> : vector<16x64xf32>
    %7 = tpu.matmul %5, %6, %cst {dimension_numbers = #tpu.dot_dimension_numbers<[1], [0], [0], [1], [0, 0, 1, 1], [], []>} : vector<16x32xbf16>, vector<32x64xbf16>, vector<16x64xf32> -> vector<16x64xf32>
    %8 = arith.addf %3, %7 : vector<16x64xf32>
    %c0_6 = arith.constant 0 : index
    %c0_7 = arith.constant 0 : index
    %9 = vector.load %arg6[%c0_6, %c0_7] : memref<16x64xf32, #tpu.memory_space<vmem>>, vector<16x64xf32>
    tpu.vector_store %arg6[%c0_6, %c0_7], %8 {strides = array<i32>} : memref<16x64xf32, #tpu.memory_space<vmem>>, vector<16x64xf32>,
    %c0_i32_8 = arith.constant 0 : i32
    %10 = arith.cmpi eq, %arg2, %c0_i32_8 : i32
    %11 = arith.extui %10 : i1 to i32
    %c0_i32_9 = arith.constant 0 : i32
    %12 = arith.cmpi ne, %11, %c0_i32_9 : i32
    scf.if %12 {
      %c0_10 = arith.constant 0 : index
      %c0_11 = arith.constant 0 : index
      %13 = vector.load %arg6[%c0_10, %c0_11] : memref<16x64xf32, #tpu.memory_space<vmem>>, vector<16x64xf32>
      %14 = arith.truncf %13 : vector<16x64xf32> to vector<16x64xbf16>
      %c0_12 = arith.constant 0 : index
      %c0_13 = arith.constant 0 : index
      %15 = vector.load %arg5[%c0_12, %c0_13] : memref<16x64xbf16, #tpu.memory_space<vmem>>, vector<16x64xbf16>
      tpu.vector_store %arg5[%c0_12, %c0_13], %14 {strides = array<i32>} : memref<16x64xbf16, #tpu.memory_space<vmem>>, vector<16x64xbf16>,
    } else {
    }
    return
  }
  func.func @transform_0(%arg0: i32, %arg1: i32, %arg2: i32) -> (i32, i32) {
    %c0_i32 = arith.constant 0 : i32
    return %arg0, %arg2 : i32, i32
  }
  func.func @transform_1(%arg0: i32, %arg1: i32, %arg2: i32) -> (i32, i32) {
    %c0_i32 = arith.constant 0 : i32
    return %arg2, %arg1 : i32, i32
  }
  func.func @transform_2(%arg0: i32, %arg1: i32, %arg2: i32) -> (i32, i32) {
    %c0_i32 = arith.constant 0 : i32
    return %arg0, %arg1 : i32, i32
  }
}

module attributes {stable_mosaic.version = 11 : i64} {
  func.func @_ffn_res_ln_kernel(%arg0: i32, %arg1: i32, %arg2: memref<16x32xf32, #tpu.memory_space<vmem>>, %arg3: memref<32x64xbf16, #tpu.memory_space<vmem>>, %arg4: memref<64x32xbf16, #tpu.memory_space<vmem>>, %arg5: memref<1x32xf32, #tpu.memory_space<vmem>>, %arg6: memref<1x32xf32, #tpu.memory_space<vmem>>, %arg7: memref<16x32xf32, #tpu.memory_space<vmem>>, %arg8: memref<16x32xf32, #tpu.memory_space<vmem>>) attributes {dimension_semantics = [#tpu.dimension_semantics<parallel>, #tpu.dimension_semantics<arbitrary>], iteration_bounds = array<i64: 1, 1>, scalar_prefetch = 0 : i64, scratch_operands = 1 : i64, tpu.core_type = #tpu.core_type<tc>, window_params = [{transform_indices = @transform_0, window_bounds = array<i64: 16, 32>}, {transform_indices = @transform_1, window_bounds = array<i64: 32, 64>}, {transform_indices = @transform_2, window_bounds = array<i64: 64, 32>}, {pipeline_mode = #tpu.pipeline_mode<synchronous>, transform_indices = @transform_3, window_bounds = array<i64: 1, 32>}, {pipeline_mode = #tpu.pipeline_mode<synchronous>, transform_indices = @transform_4, window_bounds = array<i64: 1, 32>}, {transform_indices = @transform_5, window_bounds = array<i64: 16, 32>}]} {
    %c0_i32 = arith.constant 0 : i32
    %0 = arith.cmpi eq, %arg1, %c0_i32 : i32
    %1 = arith.extui %0 : i1 to i32
    %c0_i32_0 = arith.constant 0 : i32
    %2 = arith.cmpi ne, %1, %c0_i32_0 : i32
    scf.if %2 {
      %cst_14 = arith.constant 0.000000e+00 : f32
      %18 = vector.broadcast %cst_14 : f32 to vector<16x32xf32>
      %c0_15 = arith.constant 0 : index
      %c0_16 = arith.constant 0 : index
      %19 = vector.load %arg8[%c0_15, %c0_16] : memref<16x32xf32, #tpu.memory_space<vmem>>, vector<16x32xf32>
      tpu.vector_store %arg8[%c0_15, %c0_16], %18 {strides = array<i32>} : memref<16x32xf32, #tpu.memory_space<vmem>>, vector<16x32xf32>,
    } else {
    }
    %c0 = arith.constant 0 : index
    %c0_1 = arith.constant 0 : index
    %3 = vector.load %arg2[%c0, %c0_1] : memref<16x32xf32, #tpu.memory_space<vmem>>, vector<16x32xf32>
    %4 = arith.truncf %3 : vector<16x32xf32> to vector<16x32xbf16>
    %c0_2 = arith.constant 0 : index
    %c0_3 = arith.constant 0 : index
    %5 = vector.load %arg3[%c0_2, %c0_3] : memref<32x64xbf16, #tpu.memory_space<vmem>>, vector<32x64xbf16>
    %cst = arith.constant dense<0.000000e+00> : vector<16x64xf32>
    %6 = tpu.matmul %4, %5, %cst {dimension_numbers = #tpu.dot_dimension_numbers<[1], [0], [0], [1], [0, 0, 1, 1], [], []>} : vector<16x32xbf16>, vector<32x64xbf16>, vector<16x64xf32> -> vector<16x64xf32>
    %cst_4 = arith.constant 0.000000e+00 : f32
    %7 = vector.broadcast %cst_4 : f32 to vector<16x64xf32>
    %8 = arith.maximumf %6, %7 : vector<16x64xf32>
    %c0_5 = arith.constant 0 : index
    %c0_6 = arith.constant 0 : index
    %9 = vector.load %arg8[%c0_5, %c0_6] : memref<16x32xf32, #tpu.memory_space<vmem>>, vector<16x32xf32>
    %10 = arith.truncf %8 : vector<16x64xf32> to vector<16x64xbf16>
    %c0_7 = arith.constant 0 : index
    %c0_8 = arith.constant 0 : index
    %11 = vector.load %arg4[%c0_7, %c0_8] : memref<64x32xbf16, #tpu.memory_space<vmem>>, vector<64x32xbf16>
    %cst_9 = arith.constant dense<0.000000e+00> : vector<16x32xf32>
    %12 = tpu.matmul %10, %11, %cst_9 {dimension_numbers = #tpu.dot_dimension_numbers<[1], [0], [0], [1], [0, 0, 1, 1], [], []>} : vector<16x64xbf16>, vector<64x32xbf16>, vector<16x32xf32> -> vector<16x32xf32>
    %13 = arith.addf %9, %12 : vector<16x32xf32>
    %c0_10 = arith.constant 0 : index
    %c0_11 = arith.constant 0 : index
    %14 = vector.load %arg8[%c0_10, %c0_11] : memref<16x32xf32, #tpu.memory_space<vmem>>, vector<16x32xf32>
    tpu.vector_store %arg8[%c0_10, %c0_11], %13 {strides = array<i32>} : memref<16x32xf32, #tpu.memory_space<vmem>>, vector<16x32xf32>,
    %c0_i32_12 = arith.constant 0 : i32
    %15 = arith.cmpi eq, %arg1, %c0_i32_12 : i32
    %16 = arith.extui %15 : i1 to i32
    %c0_i32_13 = arith.constant 0 : i32
    %17 = arith.cmpi ne, %16, %c0_i32_13 : i32
    scf.if %17 {
      %c0_14 = arith.constant 0 : index
      %c0_15 = arith.constant 0 : index
      %18 = vector.load %arg8[%c0_14, %c0_15] : memref<16x32xf32, #tpu.memory_space<vmem>>, vector<16x32xf32>
      %c0_16 = arith.constant 0 : index
      %c0_17 = arith.constant 0 : index
      %19 = vector.load %arg2[%c0_16, %c0_17] : memref<16x32xf32, #tpu.memory_space<vmem>>, vector<16x32xf32>
      %20 = arith.addf %18, %19 : vector<16x32xf32>
      %cst_18 = arith.constant dense<0.000000e+00> : vector<16xf32>
      %21 = vector.multi_reduction <add>, %20, %cst_18 [1] : vector<16x32xf32> to vector<16xf32>
      %22 = vector.shape_cast %21 : vector<16xf32> to vector<16x1xf32>
      %cst_19 = arith.constant 3.200000e+01 : f32
      %23 = vector.broadcast %cst_19 : f32 to vector<16x1xf32>
      %24 = arith.divf %22, %23 : vector<16x1xf32>
      %25 = vector.broadcast %24 : vector<16x1xf32> to vector<16x32xf32>
      %26 = arith.subf %20, %25 : vector<16x32xf32>
      %27 = arith.mulf %26, %26 : vector<16x32xf32>
      %cst_20 = arith.constant dense<0.000000e+00> : vector<16xf32>
      %28 = vector.multi_reduction <add>, %27, %cst_20 [1] : vector<16x32xf32> to vector<16xf32>
      %29 = vector.shape_cast %28 : vector<16xf32> to vector<16x1xf32>
      %cst_21 = arith.constant 3.200000e+01 : f32
      %30 = vector.broadcast %cst_21 : f32 to vector<16x1xf32>
      %31 = arith.divf %29, %30 : vector<16x1xf32>
      %cst_22 = arith.constant 9.99999974E-6 : f32
      %32 = vector.broadcast %cst_22 : f32 to vector<16x1xf32>
      %33 = arith.addf %31, %32 : vector<16x1xf32>
      %34 = math.rsqrt %33 : vector<16x1xf32>
      %35 = vector.broadcast %34 : vector<16x1xf32> to vector<16x32xf32>
      %36 = arith.mulf %26, %35 : vector<16x32xf32>
      %c0_23 = arith.constant 0 : index
      %c0_24 = arith.constant 0 : index
      %37 = vector.load %arg5[%c0_23, %c0_24] : memref<1x32xf32, #tpu.memory_space<vmem>>, vector<1x32xf32>
      %38 = vector.broadcast %37 : vector<1x32xf32> to vector<16x32xf32>
      %39 = arith.mulf %36, %38 : vector<16x32xf32>
      %c0_25 = arith.constant 0 : index
      %c0_26 = arith.constant 0 : index
      %40 = vector.load %arg6[%c0_25, %c0_26] : memref<1x32xf32, #tpu.memory_space<vmem>>, vector<1x32xf32>
      %41 = vector.broadcast %40 : vector<1x32xf32> to vector<16x32xf32>
      %42 = arith.addf %39, %41 : vector<16x32xf32>
      %c0_27 = arith.constant 0 : index
      %c0_28 = arith.constant 0 : index
      %43 = vector.load %arg7[%c0_27, %c0_28] : memref<16x32xf32, #tpu.memory_space<vmem>>, vector<16x32xf32>
      tpu.vector_store %arg7[%c0_27, %c0_28], %42 {strides = array<i32>} : memref<16x32xf32, #tpu.memory_space<vmem>>, vector<16x32xf32>,
    } else {
    }
    return
  }
  func.func @transform_0(%arg0: i32, %arg1: i32) -> (i32, i32) {
    %c0_i32 = arith.constant 0 : i32
    %c0_i32_0 = arith.constant 0 : i32
    return %arg0, %c0_i32 : i32, i32
  }
  func.func @transform_1(%arg0: i32, %arg1: i32) -> (i32, i32) {
    %c0_i32 = arith.constant 0 : i32
    %c0_i32_0 = arith.constant 0 : i32
    return %c0_i32, %arg1 : i32, i32
  }
  func.func @transform_2(%arg0: i32, %arg1: i32) -> (i32, i32) {
    %c0_i32 = arith.constant 0 : i32
    %c0_i32_0 = arith.constant 0 : i32
    return %arg1, %c0_i32 : i32, i32
  }
  func.func @transform_3(%arg0: i32, %arg1: i32) -> (i32, i32) {
    %c0_i32 = arith.constant 0 : i32
    %c0_i32_0 = arith.constant 0 : i32
    %c0_i32_1 = arith.constant 0 : i32
    return %c0_i32, %c0_i32_0 : i32, i32
  }
  func.func @transform_4(%arg0: i32, %arg1: i32) -> (i32, i32) {
    %c0_i32 = arith.constant 0 : i32
    %c0_i32_0 = arith.constant 0 : i32
    %c0_i32_1 = arith.constant 0 : i32
    return %c0_i32, %c0_i32_0 : i32, i32
  }
  func.func @transform_5(%arg0: i32, %arg1: i32) -> (i32, i32) {
    %c0_i32 = arith.constant 0 : i32
    %c0_i32_0 = arith.constant 0 : i32
    return %arg0, %c0_i32 : i32, i32
  }
}

module attributes {stable_mosaic.version = 11 : i64} {
  func.func @_ffn_res_ln_kernel(%arg0: i32, %arg1: i32, %arg2: memref<16x32xf32, #tpu.memory_space<vmem>>, %arg3: memref<32x64xbf16, #tpu.memory_space<vmem>>, %arg4: memref<64x32xbf16, #tpu.memory_space<vmem>>, %arg5: memref<1x32xf32, #tpu.memory_space<vmem>>, %arg6: memref<1x32xf32, #tpu.memory_space<vmem>>, %arg7: memref<16x32xf32, #tpu.memory_space<vmem>>, %arg8: memref<16x32xf32, #tpu.memory_space<vmem>>) attributes {dimension_semantics = [#tpu.dimension_semantics<parallel>, #tpu.dimension_semantics<arbitrary>], iteration_bounds = array<i64: 1, 1>, scalar_prefetch = 0 : i64, scratch_operands = 1 : i64, tpu.core_type = #tpu.core_type<tc>, window_params = [{transform_indices = @transform_0, window_bounds = array<i64: 16, 32>}, {transform_indices = @transform_1, window_bounds = array<i64: 32, 64>}, {transform_indices = @transform_2, window_bounds = array<i64: 64, 32>}, {pipeline_mode = #tpu.pipeline_mode<synchronous>, transform_indices = @transform_3, window_bounds = array<i64: 1, 32>}, {pipeline_mode = #tpu.pipeline_mode<synchronous>, transform_indices = @transform_4, window_bounds = array<i64: 1, 32>}, {transform_indices = @transform_5, window_bounds = array<i64: 16, 32>}]} {
    %c0_i32 = arith.constant 0 : i32
    %0 = arith.cmpi eq, %arg1, %c0_i32 : i32
    %1 = arith.extui %0 : i1 to i32
    %c0_i32_0 = arith.constant 0 : i32
    %2 = arith.cmpi ne, %1, %c0_i32_0 : i32
    scf.if %2 {
      %cst_14 = arith.constant 0.000000e+00 : f32
      %18 = vector.broadcast %cst_14 : f32 to vector<16x32xf32>
      %c0_15 = arith.constant 0 : index
      %c0_16 = arith.constant 0 : index
      %19 = vector.load %arg8[%c0_15, %c0_16] : memref<16x32xf32, #tpu.memory_space<vmem>>, vector<16x32xf32>
      tpu.vector_store %arg8[%c0_15, %c0_16], %18 {strides = array<i32>} : memref<16x32xf32, #tpu.memory_space<vmem>>, vector<16x32xf32>,
    } else {
    }
    %c0 = arith.constant 0 : index
    %c0_1 = arith.constant 0 : index
    %3 = vector.load %arg2[%c0, %c0_1] : memref<16x32xf32, #tpu.memory_space<vmem>>, vector<16x32xf32>
    %4 = arith.truncf %3 : vector<16x32xf32> to vector<16x32xbf16>
    %c0_2 = arith.constant 0 : index
    %c0_3 = arith.constant 0 : index
    %5 = vector.load %arg3[%c0_2, %c0_3] : memref<32x64xbf16, #tpu.memory_space<vmem>>, vector<32x64xbf16>
    %cst = arith.constant dense<0.000000e+00> : vector<16x64xf32>
    %6 = tpu.matmul %4, %5, %cst {dimension_numbers = #tpu.dot_dimension_numbers<[1], [0], [0], [1], [0, 0, 1, 1], [], []>} : vector<16x32xbf16>, vector<32x64xbf16>, vector<16x64xf32> -> vector<16x64xf32>
    %cst_4 = arith.constant 0.000000e+00 : f32
    %7 = vector.broadcast %cst_4 : f32 to vector<16x64xf32>
    %8 = arith.maximumf %6, %7 : vector<16x64xf32>
    %c0_5 = arith.constant 0 : index
    %c0_6 = arith.constant 0 : index
    %9 = vector.load %arg8[%c0_5, %c0_6] : memref<16x32xf32, #tpu.memory_space<vmem>>, vector<16x32xf32>
    %10 = arith.truncf %8 : vector<16x64xf32> to vector<16x64xbf16>
    %c0_7 = arith.constant 0 : index
    %c0_8 = arith.constant 0 : index
    %11 = vector.load %arg4[%c0_7, %c0_8] : memref<64x32xbf16, #tpu.memory_space<vmem>>, vector<64x32xbf16>
    %cst_9 = arith.constant dense<0.000000e+00> : vector<16x32xf32>
    %12 = tpu.matmul %10, %11, %cst_9 {dimension_numbers = #tpu.dot_dimension_numbers<[1], [0], [0], [1], [0, 0, 1, 1], [], []>} : vector<16x64xbf16>, vector<64x32xbf16>, vector<16x32xf32> -> vector<16x32xf32>
    %13 = arith.addf %9, %12 : vector<16x32xf32>
    %c0_10 = arith.constant 0 : index
    %c0_11 = arith.constant 0 : index
    %14 = vector.load %arg8[%c0_10, %c0_11] : memref<16x32xf32, #tpu.memory_space<vmem>>, vector<16x32xf32>
    tpu.vector_store %arg8[%c0_10, %c0_11], %13 {strides = array<i32>} : memref<16x32xf32, #tpu.memory_space<vmem>>, vector<16x32xf32>,
    %c0_i32_12 = arith.constant 0 : i32
    %15 = arith.cmpi eq, %arg1, %c0_i32_12 : i32
    %16 = arith.extui %15 : i1 to i32
    %c0_i32_13 = arith.constant 0 : i32
    %17 = arith.cmpi ne, %16, %c0_i32_13 : i32
    scf.if %17 {
      %c0_14 = arith.constant 0 : index
      %c0_15 = arith.constant 0 : index
      %18 = vector.load %arg8[%c0_14, %c0_15] : memref<16x32xf32, #tpu.memory_space<vmem>>, vector<16x32xf32>
      %c0_16 = arith.constant 0 : index
      %c0_17 = arith.constant 0 : index
      %19 = vector.load %arg2[%c0_16, %c0_17] : memref<16x32xf32, #tpu.memory_space<vmem>>, vector<16x32xf32>
      %20 = arith.addf %18, %19 : vector<16x32xf32>
      %cst_18 = arith.constant dense<0.000000e+00> : vector<16xf32>
      %21 = vector.multi_reduction <add>, %20, %cst_18 [1] : vector<16x32xf32> to vector<16xf32>
      %22 = vector.shape_cast %21 : vector<16xf32> to vector<16x1xf32>
      %cst_19 = arith.constant 3.200000e+01 : f32
      %23 = vector.broadcast %cst_19 : f32 to vector<16x1xf32>
      %24 = arith.divf %22, %23 : vector<16x1xf32>
      %25 = vector.broadcast %24 : vector<16x1xf32> to vector<16x32xf32>
      %26 = arith.subf %20, %25 : vector<16x32xf32>
      %27 = arith.mulf %26, %26 : vector<16x32xf32>
      %cst_20 = arith.constant dense<0.000000e+00> : vector<16xf32>
      %28 = vector.multi_reduction <add>, %27, %cst_20 [1] : vector<16x32xf32> to vector<16xf32>
      %29 = vector.shape_cast %28 : vector<16xf32> to vector<16x1xf32>
      %cst_21 = arith.constant 3.200000e+01 : f32
      %30 = vector.broadcast %cst_21 : f32 to vector<16x1xf32>
      %31 = arith.divf %29, %30 : vector<16x1xf32>
      %cst_22 = arith.constant 9.99999974E-6 : f32
      %32 = vector.broadcast %cst_22 : f32 to vector<16x1xf32>
      %33 = arith.addf %31, %32 : vector<16x1xf32>
      %34 = math.rsqrt %33 : vector<16x1xf32>
      %35 = vector.broadcast %34 : vector<16x1xf32> to vector<16x32xf32>
      %36 = arith.mulf %26, %35 : vector<16x32xf32>
      %c0_23 = arith.constant 0 : index
      %c0_24 = arith.constant 0 : index
      %37 = vector.load %arg5[%c0_23, %c0_24] : memref<1x32xf32, #tpu.memory_space<vmem>>, vector<1x32xf32>
      %38 = vector.broadcast %37 : vector<1x32xf32> to vector<16x32xf32>
      %39 = arith.mulf %36, %38 : vector<16x32xf32>
      %c0_25 = arith.constant 0 : index
      %c0_26 = arith.constant 0 : index
      %40 = vector.load %arg6[%c0_25, %c0_26] : memref<1x32xf32, #tpu.memory_space<vmem>>, vector<1x32xf32>
      %41 = vector.broadcast %40 : vector<1x32xf32> to vector<16x32xf32>
      %42 = arith.addf %39, %41 : vector<16x32xf32>
      %c0_27 = arith.constant 0 : index
      %c0_28 = arith.constant 0 : index
      %43 = vector.load %arg7[%c0_27, %c0_28] : memref<16x32xf32, #tpu.memory_space<vmem>>, vector<16x32xf32>
      tpu.vector_store %arg7[%c0_27, %c0_28], %42 {strides = array<i32>} : memref<16x32xf32, #tpu.memory_space<vmem>>, vector<16x32xf32>,
    } else {
    }
    return
  }
  func.func @transform_0(%arg0: i32, %arg1: i32) -> (i32, i32) {
    %c0_i32 = arith.constant 0 : i32
    %c0_i32_0 = arith.constant 0 : i32
    return %arg0, %c0_i32 : i32, i32
  }
  func.func @transform_1(%arg0: i32, %arg1: i32) -> (i32, i32) {
    %c0_i32 = arith.constant 0 : i32
    %c0_i32_0 = arith.constant 0 : i32
    return %c0_i32, %arg1 : i32, i32
  }
  func.func @transform_2(%arg0: i32, %arg1: i32) -> (i32, i32) {
    %c0_i32 = arith.constant 0 : i32
    %c0_i32_0 = arith.constant 0 : i32
    return %arg1, %c0_i32 : i32, i32
  }
  func.func @transform_3(%arg0: i32, %arg1: i32) -> (i32, i32) {
    %c0_i32 = arith.constant 0 : i32
    %c0_i32_0 = arith.constant 0 : i32
    %c0_i32_1 = arith.constant 0 : i32
    return %c0_i32, %c0_i32_0 : i32, i32
  }
  func.func @transform_4(%arg0: i32, %arg1: i32) -> (i32, i32) {
    %c0_i32 = arith.constant 0 : i32
    %c0_i32_0 = arith.constant 0 : i32
    %c0_i32_1 = arith.constant 0 : i32
    return %c0_i32, %c0_i32_0 : i32, i32
  }
  func.func @transform_5(%arg0: i32, %arg1: i32) -> (i32, i32) {
    %c0_i32 = arith.constant 0 : i32
    %c0_i32_0 = arith.constant 0 : i32
    return %arg0, %c0_i32 : i32, i32
  }
}

</mosaic_0001>

<bundles_post_ra>
// kernel: decoder_forward.18
= control target key start
LH: loop header
LB: loop body
LE: loop exit
PB: predicated region body
PF: predicated region fallthrough
CT: control target
= control target key end

     0   :  { %vm25_vm0 = vcmask 261120   ;;  %v188_v0 = vmov 0.0   ;;  %vm189_vm1 = vmmov 0   ;;  %s258_s1 = inlined_call_operand.vmem [shape: bf16[32,32], index: 1, kind: input, shape index: {}]   ;;  %s259_s0 = inlined_call_operand.vmem [shape: bf16[16,32], index: 0, kind: input, shape index: {}]   ;;  %s260_s2 = inlined_call_operand.vmem [shape: f32[16,32], index: 2, kind: input, shape index: {}]   ;;  %s261_s3 = inlined_call_operand.vmem [shape: f32[1,32], index: 3, kind: input, shape index: {}]   ;;  %s262_s4 = inlined_call_operand.vmem [shape: f32[1,32], index: 4, kind: input, shape index: {}]   ;;  %s263_s5 = inlined_call_operand.vmem [shape: f32[16,32], index: 5, kind: output, shape index: {}]  }
   0x1   :  { %171 = vmatprep.subr.bf16.mxu0 %v188_v0  ;;  %v181_v1 = vld [vmem:[%s258_s1] sm:$0xff]   ;;  %175 = vmatprep.mubr.msk.bf16.mxu0 %vm189_vm1, %v188_v0  ;;  %26 = vst.msk [vmem:[#allocation2] sm:$0xff] %vm25_vm0, %v188_v0  ;;  %27 = vst.msk [vmem:[#allocation2 + $0x8] sm:$0xff] %vm25_vm0, %v188_v0  ;;  %v182_v2 = vld [vmem:[%s258_s1 + $0x8] sm:$0xff]  }
   0x2   :  { %172 = vmatpush3.bf16.msra.mxu0 %v181_v1  ;;  %v183_v3 = vld [vmem:[%s259_s0] sm:$0xff]   ;;  %v108_v14 = vld [vmem:[%s260_s2 + $0x8] sm:$0xff] }
   0x3   :  { %173 = vmatprep.subr.bf16.mxu0 %v188_v0  ;;  %v107_v12 = vld [vmem:[%s260_s2] sm:$0xff] }
   0x4   :  { %v166_v37 = vld [vmem:[%s261_s3] ss:$0 sm:$0xff] }
   0x5   :  { %v167_v39 = vld [vmem:[%s262_s4] ss:$0 sm:$0xff] }
   0x6   :  { %174 = vmatpush3.bf16.msra.mxu0 %v182_v2 }
   0x8   :  { %v28_v4 = vld [vmem:[#allocation2] sm:$0xff]  ;;  %v29_v6 = vld [vmem:[#allocation2 + $0x8] sm:$0xff] }
   0x9   :  { %176 = vmatmul.mubr.msk.bf16.vlgmr.msra.gmra.mrb[0].mxu0 %vm25_vm0, %v183_v3 }
  0xdc   :  { %v91_v5 = vpop.f32.mrb[0].mxu0 }
  0xdd   :  { %v98_v7 = vadd.f32 %v91_v5, %v28_v4  ;;  %v177_v8 = vpop.f32.mrb[1].mxu0 }
  0xde   :  { %v94_v9 = vpop.f32.mrb[2].mxu0 }
  0xdf   :  { %100 = vst.msk [vmem:[#allocation2] sm:$0xff] %vm25_vm0, %v98_v7  ;;  %v99_v10 = vadd.f32 %v94_v9, %v29_v6  ;;  %v178_v11 = vpop.f32.mrb[3].mxu0 }
  0xe1   :  { %101 = vst.msk [vmem:[#allocation2 + $0x8] sm:$0xff] %vm25_vm0, %v99_v10 }
  0xe6   :  { %v105_v13 = vld [vmem:[#allocation2] sm:$0xff] }
  0xe7   :  { %v109_v15 = vadd.f32 %v107_v12, %v105_v13 }
  0xe8   :  { %v106_v16 = vld [vmem:[#allocation2 + $0x8] sm:$0xff] }
  0xe9   :  { %v111_v17 = vsel %vm25_vm0, %v109_v15, 0.0  ;;  %v110_v18 = vadd.f32 %v108_v14, %v106_v16 }
  0xea   :  { %112 = vadd.xlane.f32.xlu0 %v111_v17 }
  0xeb   :  { %v114_v19 = vsel %vm25_vm0, %v110_v18, 0.0 }
  0xee   :  { %115 = vadd.xlane.f32.xlu0 %v114_v19 }
 0x177   :  { %v113_v20 = vpop.xlane.xlu0 %112 }
 0x178   :  { %v118_v21 = vmul.f32 0.03125, %v113_v20 }
 0x17a   :  { %v120_v22 = vsub.f32 %v109_v15, %v118_v21 }
 0x17b   :  { %v116_v23 = vpop.xlane.xlu0 %115 }
 0x17c   :  { %v119_v24 = vmul.f32 0.03125, %v116_v23  ;;  %v122_v25 = vmul.f32 %v120_v22, %v120_v22 }
 0x17e   :  { %v121_v26 = vsub.f32 %v110_v18, %v119_v24  ;;  %v124_v27 = vsel %vm25_vm0, %v122_v25, 0.0 }
 0x17f   :  { %125 = vadd.xlane.f32.xlu1 %v124_v27 }
 0x180   :  { %v123_v28 = vmul.f32 %v121_v26, %v121_v26 }
 0x182   :  { %v127_v29 = vsel %vm25_vm0, %v123_v28, 0.0 }
 0x183   :  { %128 = vadd.xlane.f32.xlu1 %v127_v29 }
 0x20c   :  { %v126_v30 = vpop.xlane.xlu1 %125 }
 0x20d   :  { %v130_v31 = vmul.f32 0.03125, %v126_v30 }
 0x20f   :  { %v132_v32 = vadd.f32 1e-05, %v130_v31 }
 0x210   :  { %v129_v33 = vpop.xlane.xlu1 %128 }
 0x211   :  { %184 = vrsqrt.f32 %v132_v32  ;;  %v131_v34 = vmul.f32 0.03125, %v129_v33 }
 0x213   :  { %v133_v35 = vadd.f32 1e-05, %v131_v34 }
 0x215   :  { %186 = vrsqrt.f32 %v133_v35 }
 0x21b   :  { %v185_v36 = vpop.eup %184 }
 0x21c   :  { %v136_v38 = vmul.f32 %v185_v36, %v120_v22 }
 0x21e   :  { %v145_v40 = vmul.f32 %v166_v37, %v136_v38 }
 0x21f   :  { %v187_v41 = vpop.eup %186 }
 0x220   :  { %v154_v42 = vadd.f32 %v167_v39, %v145_v40  ;;  %v137_v43 = vmul.f32 %v187_v41, %v121_v26 }
 0x222   :  { %156 = vst.msk [vmem:[%s263_s5] sm:$0xff] %vm25_vm0, %v154_v42  ;;  %v146_v44 = vmul.f32 %v166_v37, %v137_v43 }
 0x224   :  { %v155_v45 = vadd.f32 %v167_v39, %v146_v44 }
 0x226   :  { %157 = vst.msk [vmem:[%s263_s5 + $0x8] sm:$0xff] %vm25_vm0, %v155_v45 }

// kernel: decoder_forward.16
= control target key start
LH: loop header
LB: loop body
LE: loop exit
PB: predicated region body
PF: predicated region fallthrough
CT: control target
= control target key end

     0   :  { %vm16_vm0 = vcmask 785408   ;;  %v132_v0 = vmov 0.0   ;;  %vm133_vm1 = vmmov 0   ;;  %vm40_vm2 = vcmask 261120   ;;  %s171_s1 = inlined_call_operand.vmem [shape: bf16[32,96], index: 1, kind: input, shape index: {}]   ;;  %s172_s0 = inlined_call_operand.vmem [shape: f32[16,32], index: 0, kind: input, shape index: {}]   ;;  %s173_s2 = inlined_call_operand.vmem [shape: bf16[16,96], index: 2, kind: output, shape index: {}]  }
   0x1   :  { %120 = vmatprep.subr.bf16.mxu0 %v132_v0  ;;  %v130_v1 = vld [vmem:[%s171_s1] sm:$0xff]   ;;  %124 = vmatprep.mubr.msk.bf16.mxu0 %vm133_vm1, %v132_v0  ;;  %17 = vst.msk [vmem:[#allocation2] sm:$0xff] %vm16_vm0, %v132_v0  ;;  %18 = vst.msk [vmem:[#allocation2 + $0x8] sm:$0xff] %vm16_vm0, %v132_v0  ;;  %v131_v2 = vld [vmem:[%s171_s1 + $0x8] sm:$0xff]   ;;  %vm103_vm3 = vcmask 781312  }
   0x2   :  { %121 = vmatpush3.bf16.msra.mxu0 %v130_v1  ;;  %v21_v3 = vld [vmem:[%s172_s0] sm:$0xff]  ;;  %v22_v4 = vld [vmem:[%s172_s0 + $0x8] sm:$0xff] }
   0x3   :  { %122 = vmatprep.subr.bf16.mxu0 %v132_v0  ;;  %v23_v5 = vpack.c.bf16 %v22_v4, %v21_v3 }
   0x6   :  { %123 = vmatpush3.bf16.msra.mxu0 %v131_v2 }
   0x8   :  { %v19_v6 = vld [vmem:[#allocation2] sm:$0xff]  ;;  %v20_v8 = vld [vmem:[#allocation2 + $0x8] sm:$0xff] }
   0x9   :  { %125 = vmatmul.mubr.msk.bf16.vlgmr.msra.gmra.mrb[0].mxu0 %vm40_vm2, %v23_v5 }
  0xdc   :  { %v78_v7 = vpop.f32.mrb[0].mxu0 }
  0xdd   :  { %v85_v9 = vadd.f32 %v78_v7, %v19_v6  ;;  %v126_v10 = vpop.f32.mrb[1].mxu0 }
  0xde   :  { %v81_v11 = vpop.f32.mrb[2].mxu0 }
  0xdf   :  { %88 = vst.msk [vmem:[#allocation2] sm:$0xff] %vm16_vm0, %v85_v9  ;;  %v86_v12 = vadd.f32 %v81_v11, %v20_v8  ;;  %v127_v13 = vpop.f32.mrb[3].mxu0 }
  0xe1   :  { %89 = vst.msk [vmem:[#allocation2 + $0x8] sm:$0xff] %vm16_vm0, %v86_v12 }
  0xe6   :  { %v93_v14 = vld [vmem:[#allocation2] sm:$0xff] }
  0xe7   :  { %v115_v15 = vpack.c.bf16 %v93_v14, %v93_v14 }
  0xe8   :  { %v94_v16 = vld [vmem:[#allocation2 + $0x8] sm:$0xff] }
  0xe9   :  { %104 = vst.msk [vmem:[%s173_s2] sm:$0xf] %vm103_vm3, %v115_v15  ;;  %v116_v17 = vpack.c.bf16 %v94_v16, %v94_v16 }
  0xeb   :  { %105 = vst.msk [vmem:[%s173_s2 + $0x4] sm:$0xf] %vm103_vm3, %v116_v17 }

// kernel: decoder_forward.17
= control target key start
LH: loop header
LB: loop body
LE: loop exit
PB: predicated region body
PF: predicated region fallthrough
CT: control target
= control target key end

     0   :  { %s1202_s12 = smov 0   ;;  %s1204_s13 = smov 0   ;;  %s1408_s0 = inlined_call_operand.vmem [shape: bf16[2,8,32], index: 0, kind: input, shape index: {}]   ;;  %s1409_s1 = inlined_call_operand.vmem [shape: bf16[2,8,32], index: 1, kind: input, shape index: {}]   ;;  %s1410_s2 = inlined_call_operand.vmem [shape: bf16[2,8,32], index: 2, kind: input, shape index: {}]   ;;  %s1411_s3 = inlined_call_operand.vmem [shape: bf16[2,8,32], index: 3, kind: output, shape index: {}]  }
   0x1   :  { %s1206_s14 = smov 0  }
   0x2 LB: > { %s32_s15 = sadd.s32 1, %s1163_s13  ;;  %p987_p0 = scmp.ge.s32.totalorder %s1167_s14, 1  ;;  %s1167_s14 = sphi %s1206_s14, %s13_s14   ;;  %s1163_s13 = sphi %s1204_s13, %s1413_s13   ;;  %s1159_s12 = sphi %s1202_s12, %s1412_s12  }
   0x3   : > { %p34_p1 = scmp.ge.s32.totalorder %s32_s15, 2  ;;  %p190_p2 = scmp.lt.s32.totalorder %s1167_s14, 3 }
   0x5   : > { %s1415_s15 = smov (%p34_p1, %s32_s15), 0  ;;  %p191_p3 = pnand %p987_p0, %p190_p2 }
   0x6   : > { %p232_p4 = scmp.lt.s32.totalorder (!%p191_p3), %s1159_s12, 1  ;;  %v1169_v0 = vmov (!%p191_p3), 0.0   ;;  %vm1170_vm0 = vmmov (!%p191_p3), 0   ;;  %vm273_vm1 = vcmask (!%p191_p3), 64512   ;;  %vm265_vm2 = vcmask (!%p191_p3), 31744   ;;  %s1173_s23 = smov (!%p191_p3), 120  }
   0x7   : > { %194 = sbr.rel (%p191_p3) target bundleno = 1455 (0x5af), region = 32  ;;  %1021 = vmatprep.subr.bf16.mxu0 (!%p191_p3), %v1169_v0  ;;  %1023 = vmatprep.mubr.msk.bf16.mxu0 (!%p191_p3), %vm1170_vm0, %v1169_v0  ;;  %v1171_v4 = vmov (!%p191_p3), -inf   ;;  %267 = vst.msk [vmem:[#allocation3] sm:$0xff] (!%p191_p3), %vm265_vm2, %v1169_v0  ;;  %v1172_v11 = vmov (!%p191_p3), 0   ;;  %s1174_s24 = smov (!%p191_p3), 112   ;;  %vm343_vm3 = vcmask (!%p191_p3), 7168  }
   0x8   : > { %1027 = vmatprep.subr.bf16.mxu1 (!%p191_p3), %v1169_v0  ;;  %1029 = vmatprep.mubr.msk.bf16.mxu1 (!%p191_p3), %vm1170_vm0, %v1169_v0  ;;  %266 = vst.msk [vmem:[#allocation2] sm:$0xff] (!%p191_p3), %vm265_vm2, %v1171_v4  ;;  %s1175_s25 = smov (!%p191_p3), 104   ;;  %vm356_vm4 = vcmask (!%p191_p3), 1043456   ;;  %v1176_v56 = vmov (!%p191_p3), 1   ;;  %v1177_v57 = vmov (!%p191_p3), 2   ;;  %vm482_vm5 = vcmask (!%p191_p3), 15368  }
   0x9   : > { %1106 = vset.pattern.permute.xlu0 (!%p191_p3), %v1172_v11  ;;  %1107 = vset.pattern.permute.xlu1 (!%p191_p3), %v1176_v56  ;;  %vm624_vm6 = vcmask (!%p191_p3), 23568   ;;  %vm763_vm7 = vcmask (!%p191_p3), 31768   ;;  %vm268_vm8 = vcmask (!%p191_p3), 261120   ;;  %s1179_s29 = smov (!%p191_p3), 8   ;;  %s1180_s30 = smov (!%p191_p3), 16   ;;  %vm548_vm9 = vcmask (!%p191_p3), 130112  }
   0xa   : > { %269 = vst.msk [vmem:[#allocation4] sm:$0xff] (!%p191_p3), %vm268_vm8, %v1169_v0  ;;  %s1181_s4 = smov (!%p191_p3), 24   ;;  %vm687_vm10 = vcmask (!%p191_p3), 195712   ;;  %vm826_vm11 = vcmask (!%p191_p3), 261312   ;;  %vm874_vm12 = vcmask (!%p191_p3), 257024  }
   0xe   : > { %s1417_s12 = smov (!%p232_p4, %s1159_s12), 1 }
   0xf   : > { %s1226_s16 = sshll.u32 %s1417_s12, 2  ;;  %v1250_v14 = vld [vmem:[#allocation2] sm:$0xff] }
  0x10   : > { %s245_s19 = scalar_lea.vmem %s1409_s1, %s1226_s16  ;;  %s238_s22 = scalar_lea.vmem %s1408_s0, %s1226_s16 }
  0x11   : > { %v271_v1 = vld [vmem:[%s245_s19] sm:$0xf]  ;;  %s252_s28 = scalar_lea.vmem %s1410_s2, %s1226_s16  ;;  %s259_s7 = scalar_lea.vmem %s1411_s3, %s1226_s16 }
  0x12   : > { %v278_v2 = vsel %vm273_vm1, %v271_v1, 0  ;;  %v270_v3 = vld [vmem:[%s238_s22] sm:$0xf]  ;;  %v995_v12 = vcombine.low %v271_v1, %v271_v1  ;;  %v1178_v1 = vmov 3  }
  0x13   : > { %1022 = vmatpush3.bf16.xpose.msra.mxu0 %v278_v2  ;;  %v994_v13 = vcombine.low %v270_v3, %v270_v3  ;;  %v1264_v18 = vld [vmem:[%s252_s28] sm:$0xf] }
  0x14   : > { %1039 = vmatprep.subr.bf16.mxu0 %v1169_v0  ;;  %411 = vrot.lane.b32.xlu1 %v995_v12, %s1173_s23  ;;  %v358_v19 = vsel %vm356_vm4, %v1264_v18, 0  ;;  %v997_v61 = vcombine.low %v1264_v18, %v1264_v18 }
  0x15   : > { %1028 = vmatpush3.bf16.msra.mxu1 %v358_v19 }
  0x16   : > { %1033 = vmatprep.subr.bf16.mxu1 %v1169_v0 }
  0x18   : > { %406 = vrot.lane.b32.xlu1 %v994_v13, %s1173_s23 }
  0x1a   : > { %1024 = vmatmul.mubr.msk.bf16.vlgmr.msra.gmra.mrb[0].mxu0 %vm273_vm1, %v270_v3 }
  0x1b   : > { %1041 = vmatprep.mubr.msk.bf16.mxu0 %vm1170_vm0, %v1169_v0 }
  0x1c   : > { %553 = vrot.lane.b32.xlu1 %v995_v12, %s1174_s24 }
  0x20   : > { %551 = vrot.lane.b32.xlu1 %v994_v13, %s1174_s24 }
  0x24   : > { %692 = vrot.lane.b32.xlu1 %v995_v12, %s1175_s25 }
  0x28   : > { %690 = vrot.lane.b32.xlu1 %v994_v13, %s1175_s25 }
  0x86   : > { %v412_v23 = vpop.permute.xlu1 %411 }
  0x87   : > { %v417_v26 = vsel %vm273_vm1, %v412_v23, 0 }
  0x8a   : > { %v407_v24 = vpop.permute.xlu1 %406 }
  0x8e   : > { %v554_v28 = vpop.permute.xlu1 %553 }
  0x8f   : > { %v559_v30 = vsel %vm273_vm1, %v554_v28, 0 }
  0x92   : > { %v552_v29 = vpop.permute.xlu1 %551 }
  0x96   : > { %v693_v31 = vpop.permute.xlu1 %692 }
  0x97   : > { %v698_v32 = vsel %vm273_vm1, %v693_v31, 0 }
  0x9a   : > { %v691_v33 = vpop.permute.xlu1 %690 }
  0xed   : > { %v314_v5 = vpop.f32.mrb[0].mxu0 }
  0xee   : > { %v320_v6 = vmul.f32 0.35355338, %v314_v5  ;;  %v1025_v7 = vpop.f32.mrb[1].mxu0 }
  0xef   : > { %v317_v8 = vpop.f32.mrb[2].mxu0 }
  0xf0   : > { %v1026_v9 = vpop.f32.mrb[3].mxu0  ;;  %v322_v10 = vsel %vm273_vm1, %v320_v6, -inf }
  0xf1   : > { %323 = vmax.xlane.f32.xlu0 %v322_v10 }
 0x17e   : > { %v324_v15 = vpop.xlane.xlu0 %323 }
 0x17f   : > { %v1253_v16 = vmax.f32 %v1250_v14, %v324_v15 }
 0x181   : > { %v326_v17 = vsub.f32 %v1250_v14, %v1253_v16  ;;  %402 = vst.msk [vmem:[#allocation2] sm:$0xff] %vm343_vm3, %v1253_v16  ;;  %331 = vperm.xlu0 %1106, %v1253_v16  }
 0x183   : > { %v327_v10 = vmul.f32 1.442695, %v326_v17 }
 0x185   : > { %1108 = vset.pattern.permute.xlu0 %v1177_v57 }
 0x188   : > { %v1304_v59 = vld [vmem:[#allocation2] sm:$0xff] }
 0x200   : > { %v332_v20 = vpop.permute.xlu0 %331 }
 0x201   : > { %v334_v21 = vsub.f32 %v320_v6, %v332_v20 }
 0x203   : > { %v335_v22 = vmul.f32 1.442695, %v334_v21 }
 0x205   : > { %1121 = vpow2.f32 %v335_v22 }
 0x206   : > { %1123 = vpow2.f32 %v327_v10 }
 0x20f   : > { %v1269_v25 = vpop.eup %1121 }
 0x210   : > { %v352_v27 = vpack.c.bf16 %v1269_v25, %v1269_v25  ;;  %v339_v9 = vsel %vm273_vm1, %v1269_v25, 0.0  ;;  %v1124_v12 = vpop.eup %1123 }
 0x212   : > { %1030 = vmatmul.mubr.msk.bf16.vlgmr.msra.gmra.mrb[0].mxu1 %vm273_vm1, %v352_v27 }
 0x213   : > { %1034 = vmatpush3.bf16.xpose.msra.mxu1 %v417_v26  ;;  %1035 = vmatprep.mubr.msk.bf16.mxu1 %vm1170_vm0, %v1169_v0 }
 0x214   : > { %1045 = vmatprep.subr.bf16.mxu1 %v1169_v0 }
 0x21a   : > { %1036 = vmatmul.mubr.msk.bf16.vlgmr.msra.gmra.mrb[4].mxu1 %vm273_vm1, %v407_v24 }
 0x21b   : > { %1046 = vmatpush3.bf16.xpose.msra.mxu1 %v559_v30  ;;  %1047 = vmatprep.mubr.msk.bf16.mxu1 %vm1170_vm0, %v1169_v0 }
 0x21c   : > { %1057 = vmatprep.subr.bf16.mxu1 %v1169_v0 }
 0x222   : > { %1048 = vmatmul.mubr.msk.bf16.vlgmr.msra.gmra.mrb[8].mxu1 %vm273_vm1, %v552_v29 }
 0x223   : > { %1058 = vmatpush3.bf16.xpose.msra.mxu1 %v698_v32  ;;  %1059 = vmatprep.mubr.msk.bf16.mxu1 %vm1170_vm0, %v1169_v0 }
 0x22a   : > { %1060 = vmatmul.mubr.msk.bf16.vlgmr.msra.gmra.mrb[12].mxu1 %vm273_vm1, %v691_v33 }
 0x2e5   : > { %v1288_v34 = vpop.f32.mrb[0].mxu1 }
 0x2e6   : > { %v1031_v35 = vpop.f32.mrb[1].mxu1 }
 0x2e7   : > { %v397_v36 = vpop.f32.mrb[2].mxu1 }
 0x2e8   : > { %v1032_v37 = vpop.f32.mrb[3].mxu1 }
 0x2ed   : > { %v453_v38 = vpop.f32.mrb[4].mxu1 }
 0x2ee   : > { %v1290_v39 = vmul.f32 0.35355338, %v453_v38  ;;  %v1037_v40 = vpop.f32.mrb[5].mxu1 }
 0x2ef   : > { %v456_v41 = vpop.f32.mrb[6].mxu1 }
 0x2f0   : > { %v1038_v42 = vpop.f32.mrb[7].mxu1  ;;  %v461_v43 = vsel %vm273_vm1, %v1290_v39, -inf  ;;  %v337_v41 = vld [vmem:[#allocation3] sm:$0xff] }
 0x2f1   : > { %462 = vmax.xlane.f32.xlu1 %v461_v43  ;;  %v338_v42 = vmul.f32 %v1124_v12, %v337_v41 }
 0x2f5   : > { %v595_v44 = vpop.f32.mrb[8].mxu1 }
 0x2f6   : > { %v1294_v45 = vmul.f32 0.35355338, %v595_v44  ;;  %v1049_v46 = vpop.f32.mrb[9].mxu1 }
 0x2f7   : > { %v598_v47 = vpop.f32.mrb[10].mxu1 }
 0x2f8   : > { %v1050_v48 = vpop.f32.mrb[11].mxu1  ;;  %v603_v49 = vsel %vm273_vm1, %v1294_v45, -inf }
 0x2f9   : > { %604 = vmax.xlane.f32.xlu0 %v603_v49 }
 0x2fd   : > { %v734_v50 = vpop.f32.mrb[12].mxu1 }
 0x2fe   : > { %v1298_v51 = vmul.f32 0.35355338, %v734_v50  ;;  %v1061_v52 = vpop.f32.mrb[13].mxu1 }
 0x2ff   : > { %v737_v53 = vpop.f32.mrb[14].mxu1 }
 0x300   : > { %v1062_v54 = vpop.f32.mrb[15].mxu1  ;;  %v742_v55 = vsel %vm273_vm1, %v1298_v51, -inf }
 0x301   : > { %743 = vmax.xlane.f32.xlu1 %v742_v55 }
 0x37e   : > { %v463_v58 = vpop.xlane.xlu1 %462 }
 0x37f   : > { %v1307_v60 = vmax.f32 %v1304_v59, %v463_v58 }
 0x381   : > { %v465_v62 = vsub.f32 %v1304_v59, %v1307_v60  ;;  %550 = vst.msk [vmem:[#allocation2] sm:$0xff] %vm482_vm5, %v1307_v60  ;;  %470 = vperm.xlu1 %1107, %v1307_v60  }
 0x383   : > { %v466_v38 = vmul.f32 1.442695, %v465_v62 }
 0x385   : > { %495 = vrot.lane.b32.xlu1 %v997_v61, %s1173_s23 }
 0x386   : > { %v605_v63 = vpop.xlane.xlu0 %604  ;;  %1109 = vset.pattern.permute.xlu1 %v1178_v1 }
 0x388   : > { %v1318_v2 = vld [vmem:[#allocation2] sm:$0xff] }
 0x389   : > { %v1321_v3 = vmax.f32 %v1318_v2, %v605_v63 }
 0x38b   : > { %v607_v4 = vsub.f32 %v1318_v2, %v1321_v3  ;;  %689 = vst.msk [vmem:[#allocation2] sm:$0xff] %vm624_vm6, %v1321_v3  ;;  %612 = vperm.xlu0 %1108, %v1321_v3  }
 0x38e   : > { %v744_v5 = vpop.xlane.xlu1 %743 }
 0x38f   : > { %1111 = vset.pattern.permute.xlu0 %v1176_v56 }
 0x392   : > { %v1329_v6 = vld [vmem:[#allocation2] sm:$0xff] }
 0x393   : > { %v1332_v7 = vmax.f32 %v1329_v6, %v744_v5 }
 0x395   : > { %v746_v8 = vsub.f32 %v1329_v6, %v1332_v7  ;;  %828 = vst.msk [vmem:[#allocation2] sm:$0xff] %vm763_vm7, %v1332_v7  ;;  %751 = vperm.xlu1 %1109, %v1332_v7  }
 0x397   : > { %v747_v53 = vmul.f32 1.442695, %v746_v8 }
 0x399   : > { %634 = vrot.lane.b32.xlu1 %v997_v61, %s1174_s24 }
 0x39a   : > { %1110 = vset.pattern.permute.xlu1 %v1172_v11 }
 0x39d   : > { %773 = vrot.lane.b32.xlu1 %v997_v61, %s1175_s25 }
 0x3c1   : > { %340 = vadd.xlane.f32.xlu1 %v339_v9 }
 0x3d2   : > { %348 = vperm.xlu1 %1110, %v1124_v12  }
 0x3d6   : > { %1113 = vset.pattern.permute.xlu1 %v1178_v1 }
 0x400   : > { %v471_v13 = vpop.permute.xlu1 %470 }
 0x401   : > { %v473_v15 = vsub.f32 %v1290_v39, %v471_v13  ;;  %v608_v39 = vmul.f32 1.442695, %v607_v4 }
 0x403   : > { %v474_v18 = vmul.f32 1.442695, %v473_v15 }
 0x404   : > { %v496_v19 = vpop.permute.xlu1 %495 }
 0x405   : > { %1125 = vpow2.f32 %v474_v18  ;;  %v501_v20 = vsel %vm356_vm4, %v496_v19, 0 }
 0x406   : > { %1040 = vmatpush3.bf16.msra.mxu0 %v501_v20 }
 0x407   : > { %1051 = vmatprep.subr.bf16.mxu0 %v1169_v0 }
 0x40a   : > { %v613_v14 = vpop.permute.xlu0 %612 }
 0x40b   : > { %v615_v16 = vsub.f32 %v1294_v45, %v613_v14  ;;  %v345_v45 = vld [vmem:[#allocation4] sm:$0xff] }
 0x40d   : > { %v616_v17 = vmul.f32 1.442695, %v615_v16 }
 0x40f   : > { %v1126_v21 = vpop.eup %1125  ;;  %1127 = vpow2.f32 %v616_v17 }
 0x410   : > { %v478_v22 = vsel %vm273_vm1, %v1126_v21, 0.0  ;;  %v491_v23 = vpack.c.bf16 %v1126_v21, %v1126_v21 }
 0x411   : > { %479 = vadd.xlane.f32.xlu0 %v478_v22 }
 0x412   : > { %1042 = vmatmul.mubr.msk.bf16.vlgmr.msra.gmra.mrb[4].mxu0 %vm273_vm1, %v491_v23 }
 0x413   : > { %1053 = vmatprep.mubr.msk.bf16.mxu0 %vm1170_vm0, %v1169_v0 }
 0x414   : > { %v752_v24 = vpop.permute.xlu1 %751 }
 0x415   : > { %v754_v25 = vsub.f32 %v1298_v51, %v752_v24 }
 0x417   : > { %v755_v26 = vmul.f32 1.442695, %v754_v25 }
 0x418   : > { %v635_v27 = vpop.permute.xlu1 %634 }
 0x419   : > { %v1128_v28 = vpop.eup %1127  ;;  %1129 = vpow2.f32 %v755_v26  ;;  %v640_v29 = vsel %vm356_vm4, %v635_v27, 0 }
 0x41a   : > { %1052 = vmatpush3.bf16.msra.mxu0 %v640_v29  ;;  %v620_v30 = vsel %vm273_vm1, %v1128_v28, 0.0  ;;  %v633_v31 = vpack.c.bf16 %v1128_v28, %v1128_v28  ;;  %1131 = vpow2.f32 %v466_v38 }
 0x41b   : > { %621 = vadd.xlane.f32.xlu1 %v620_v30  ;;  %1063 = vmatprep.subr.bf16.mxu0 %v1169_v0  ;;  %1133 = vpow2.f32 %v608_v39 }
 0x41c   : > { %v774_v32 = vpop.permute.xlu1 %773  ;;  %1135 = vpow2.f32 %v747_v53 }
 0x41d   : > { %1054 = vmatmul.mubr.msk.bf16.vlgmr.msra.gmra.mrb[8].mxu0 %vm273_vm1, %v633_v31  ;;  %v779_v33 = vsel %vm356_vm4, %v774_v32, 0 }
 0x41e   : > { %1064 = vmatpush3.bf16.msra.mxu0 %v779_v33  ;;  %1065 = vmatprep.mubr.msk.bf16.mxu0 %vm1170_vm0, %v1169_v0 }
 0x423   : > { %v1130_v35 = vpop.eup %1129 }
 0x424   : > { %v759_v36 = vsel %vm273_vm1, %v1130_v35, 0.0  ;;  %v772_v37 = vpack.c.bf16 %v1130_v35, %v1130_v35  ;;  %v1132_v40 = vpop.eup %1131 }
 0x425   : > { %760 = vadd.xlane.f32.xlu0 %v759_v36  ;;  %v1134_v0 = vpop.eup %1133 }
 0x426   : > { %1066 = vmatmul.mubr.msk.bf16.vlgmr.msra.gmra.mrb[12].mxu0 %vm273_vm1, %v772_v37 }
 0x43b   : > { %487 = vperm.xlu0 %1111, %v1132_v40  }
 0x43f   : > { %1112 = vset.pattern.permute.xlu0 %v1177_v57 }
 0x440   : > { %629 = vperm.xlu0 %1112, %v1134_v0  }
 0x444   : > { %1115 = vset.pattern.permute.xlu0 %v1176_v56 }
 0x44e   : > { %v341_v43 = vpop.xlane.xlu1 %340 }
 0x44f   : > { %v342_v44 = vadd.f32 %v341_v43, %v338_v42 }
 0x451   : > { %344 = vst.msk [vmem:[#allocation3] sm:$0xff] %vm343_vm3, %v342_v44 }
 0x452   : > { %v349_v46 = vpop.permute.xlu1 %348 }
 0x453   : > { %v351_v47 = vmul.f32 %v349_v46, %v345_v45 }
 0x455   : > { %v400_v48 = vadd.f32 %v1288_v34, %v351_v47  ;;  %v1136_v34 = vpop.eup %1135 }
 0x457   : > { %401 = vst.msk [vmem:[#allocation4] sm:$0xff] %vm273_vm1, %v400_v48 }
 0x458   : > { %v476_v49 = vld [vmem:[#allocation3] sm:$0xff] }
 0x459   : > { %v477_v50 = vmul.f32 %v1132_v40, %v476_v49 }
 0x45e   : > { %v484_v18 = vld [vmem:[#allocation4] sm:$0xff] }
 0x49e   : > { %v480_v51 = vpop.xlane.xlu0 %479 }
 0x49f   : > { %v481_v52 = vadd.f32 %v480_v51, %v477_v50 }
 0x4a1   : > { %483 = vst.msk [vmem:[#allocation3] sm:$0xff] %vm482_vm5, %v481_v52 }
 0x4a8   : > { %v618_v54 = vld [vmem:[#allocation3] sm:$0xff]  ;;  %v622_v56 = vpop.xlane.xlu1 %621 }
 0x4a9   : > { %v619_v55 = vmul.f32 %v1134_v0, %v618_v54 }
 0x4ab   : > { %v623_v58 = vadd.f32 %v622_v56, %v619_v55 }
 0x4ad   : > { %625 = vst.msk [vmem:[#allocation3] sm:$0xff] %vm624_vm6, %v623_v58 }
 0x4b2   : > { %v761_v61 = vpop.xlane.xlu0 %760 }
 0x4b4   : > { %v757_v59 = vld [vmem:[#allocation3] sm:$0xff] }
 0x4b5   : > { %v758_v60 = vmul.f32 %v1136_v34, %v757_v59 }
 0x4b7   : > { %v762_v62 = vadd.f32 %v761_v61, %v758_v60 }
 0x4b9   : > { %764 = vst.msk [vmem:[#allocation3] sm:$0xff] %vm763_vm7, %v762_v62 }
 0x4c0   : > { %v833_v9 = vld [vmem:[#allocation3] sm:$0xff] }
 0x4e5   : > { %v537_v63 = vpop.f32.mrb[4].mxu0 }
 0x4e6   : > { %544 = vrot.lane.b32.xlu1 %v537_v63, %s1179_s29  ;;  %v1043_v2 = vpop.f32.mrb[5].mxu0 }
 0x4e7   : > { %v540_v3 = vpop.f32.mrb[6].mxu0 }
 0x4e8   : > { %v1044_v4 = vpop.f32.mrb[7].mxu0 }
 0x4ea   : > { %768 = vperm.xlu1 %1113, %v1136_v34  }
 0x4ee   : > { %1114 = vset.pattern.permute.xlu1 %v1172_v11  ;;  %v488_v11 = vpop.permute.xlu0 %487 }
 0x4ef   : > { %v490_v19 = vmul.f32 %v488_v11, %v484_v18 }
 0x4f0   : > { %v676_v5 = vpop.f32.mrb[8].mxu0 }
 0x4f1   : > { %683 = vrot.lane.b32.xlu1 %v676_v5, %s1180_s30  ;;  %v1055_v6 = vpop.f32.mrb[9].mxu0 }
 0x4f2   : > { %v679_v7 = vpop.f32.mrb[10].mxu0  ;;  %v630_v17 = vpop.permute.xlu0 %629 }
 0x4f3   : > { %v1056_v8 = vpop.f32.mrb[11].mxu0 }
 0x4f5   : > { %836 = vperm.xlu1 %1114, %v833_v9  }
 0x4f9   : > { %1116 = vset.pattern.permute.xlu1 %v1177_v57  ;;  %v815_v10 = vpop.f32.mrb[12].mxu0 }
 0x4fa   : > { %856 = vperm.xlu1 %1116, %v833_v9   ;;  %822 = vrot.lane.b32.xlu0 %v815_v10, %s1181_s4  ;;  %v1067_v12 = vpop.f32.mrb[13].mxu0 }
 0x4fb   : > { %v818_v13 = vpop.f32.mrb[14].mxu0 }
 0x4fc   : > { %v1068_v15 = vpop.f32.mrb[15].mxu0 }
 0x4fe   : > { %1117 = vset.pattern.permute.xlu1 %v1178_v1  ;;  %846 = vperm.xlu0 %1115, %v833_v9  }
 0x4ff   : > { %866 = vperm.xlu1 %1117, %v833_v9  }
 0x502   : > { %1118 = vset.pattern.permute.xlu0 %v1178_v1 }
 0x558   : > { %v545_v20 = vpop.permute.xlu1 %544 }
 0x559   : > { %v547_v14 = vadd.f32 %v545_v20, %v490_v19 }
 0x55b   : > { %549 = vst.msk [vmem:[#allocation4] sm:$0xff] %vm548_vm9, %v547_v14 }
 0x562   : > { %v626_v16 = vld [vmem:[#allocation4] sm:$0xff] }
 0x563   : > { %v632_v21 = vmul.f32 %v630_v17, %v626_v16 }
 0x569   : > { %v769_v57 = vpop.permute.xlu1 %768 }
 0x56c   : > { %v823_v26 = vpop.permute.xlu0 %822 }
 0x56d   : > { %v684_v22 = vpop.permute.xlu1 %683 }
 0x56e   : > { %v686_v23 = vadd.f32 %v684_v22, %v632_v21 }
 0x570   : > { %688 = vst.msk [vmem:[#allocation4] sm:$0xff] %vm687_vm10, %v686_v23 }
 0x574   : > { %v837_v24 = vpop.permute.xlu1 %836 }
 0x575   : > { %1137 = vrcp.f32 %v837_v24 }
 0x577   : > { %v765_v25 = vld [vmem:[#allocation4] sm:$0xff] }
 0x578   : > { %v771_v1 = vmul.f32 %v769_v57, %v765_v25 }
 0x579   : > { %v857_v32 = vpop.permute.xlu1 %856 }
 0x57a   : > { %v825_v27 = vadd.f32 %v823_v26, %v771_v1 }
 0x57c   : > { %827 = vst.msk [vmem:[#allocation4] sm:$0xff] %vm826_vm11, %v825_v27 }
 0x57d   : > { %v847_v28 = vpop.permute.xlu0 %846 }
 0x57e   : > { %1139 = vrcp.f32 %v847_v28  ;;  %v867_v37 = vpop.permute.xlu1 %866 }
 0x57f   : > { %v1138_v29 = vpop.eup %1137  ;;  %1141 = vrcp.f32 %v857_v32 }
 0x580   : > { %1143 = vrcp.f32 %v867_v37 }
 0x583   : > { %v832_v30 = vld [vmem:[#allocation4] sm:$0xff] }
 0x584   : > { %v840_v31 = vmul.f32 %v1138_v29, %v832_v30 }
 0x586   : > { %841 = vst.msk [vmem:[#allocation4] sm:$0xff] %vm273_vm1, %v840_v31 }
 0x588   : > { %v1140_v33 = vpop.eup %1139 }
 0x589   : > { %v1142_v38 = vpop.eup %1141 }
 0x58a   : > { %v1144_v0 = vpop.eup %1143 }
 0x58d   : > { %v842_v35 = vld [vmem:[#allocation4] sm:$0xff] }
 0x58e   : > { %v850_v36 = vmul.f32 %v1140_v33, %v842_v35 }
 0x590   : > { %851 = vst.msk [vmem:[#allocation4] sm:$0xff] %vm548_vm9, %v850_v36 }
 0x597   : > { %v852_v39 = vld [vmem:[#allocation4] sm:$0xff] }
 0x598   : > { %v860_v40 = vmul.f32 %v1142_v38, %v852_v39 }
 0x59a   : > { %861 = vst.msk [vmem:[#allocation4] sm:$0xff] %vm687_vm10, %v860_v40 }
 0x5a1   : > { %v862_v41 = vld [vmem:[#allocation4] sm:$0xff] }
 0x5a2   : > { %v870_v42 = vmul.f32 %v1144_v0, %v862_v41 }
 0x5a4   : > { %871 = vst.msk [vmem:[#allocation4] sm:$0xff] %vm826_vm11, %v870_v42 }
 0x5ab   : > { %v872_v43 = vld [vmem:[#allocation4] sm:$0xff] }
 0x5ac   : > { %v873_v44 = vpack.c.bf16 %v872_v43, %v872_v43 }
 0x5ae   : > { %875 = vst.msk [vmem:[%s259_s7] sm:$0xf] %vm874_vm12, %v873_v44 }
 0x5af PF: > { %s13_s14 = sadd.s32 1, %s1167_s14   ;;  %s1412_s12 = smov %s1163_s13 }
 0x5b0   : > { %p10_p5 = scmp.ge.s32.totalorder %s13_s14, 4   ;;  %s1413_s13 = smov %s1415_s15 }
 0x5b2   :  { %12 = sbr.rel (!%p10_p5) target bundleno = 2 (0x2), region = 76 }

// kernel: decoder_forward.19
= control target key start
LH: loop header
LB: loop body
LE: loop exit
PB: predicated region body
PF: predicated region fallthrough
CT: control target
= control target key end

     0   :  { %vm16_vm0 = vcmask 261120   ;;  %v131_v0 = vmov 0.0   ;;  %vm132_vm1 = vmmov 0   ;;  %vm102_vm2 = vcmask 257024   ;;  %s171_s1 = inlined_call_operand.vmem [shape: bf16[32,32], index: 1, kind: input, shape index: {}]   ;;  %s172_s0 = inlined_call_operand.vmem [shape: f32[16,32], index: 0, kind: input, shape index: {}]   ;;  %s173_s2 = inlined_call_operand.vmem [shape: bf16[16,32], index: 2, kind: output, shape index: {}]  }
   0x1   :  { %119 = vmatprep.subr.bf16.mxu0 %v131_v0  ;;  %v129_v1 = vld [vmem:[%s171_s1] sm:$0xff]   ;;  %123 = vmatprep.mubr.msk.bf16.mxu0 %vm132_vm1, %v131_v0  ;;  %17 = vst.msk [vmem:[#allocation2] sm:$0xff] %vm16_vm0, %v131_v0  ;;  %18 = vst.msk [vmem:[#allocation2 + $0x8] sm:$0xff] %vm16_vm0, %v131_v0  ;;  %v130_v2 = vld [vmem:[%s171_s1 + $0x8] sm:$0xff]  }
   0x2   :  { %120 = vmatpush3.bf16.msra.mxu0 %v129_v1  ;;  %v21_v3 = vld [vmem:[%s172_s0] sm:$0xff]  ;;  %v22_v4 = vld [vmem:[%s172_s0 + $0x8] sm:$0xff] }
   0x3   :  { %121 = vmatprep.subr.bf16.mxu0 %v131_v0  ;;  %v23_v5 = vpack.c.bf16 %v22_v4, %v21_v3 }
   0x6   :  { %122 = vmatpush3.bf16.msra.mxu0 %v130_v2 }
   0x8   :  { %v19_v6 = vld [vmem:[#allocation2] sm:$0xff]  ;;  %v20_v8 = vld [vmem:[#allocation2 + $0x8] sm:$0xff] }
   0x9   :  { %124 = vmatmul.mubr.msk.bf16.vlgmr.msra.gmra.mrb[0].mxu0 %vm16_vm0, %v23_v5 }
  0xdc   :  { %v78_v7 = vpop.f32.mrb[0].mxu0 }
  0xdd   :  { %v85_v9 = vadd.f32 %v78_v7, %v19_v6  ;;  %v125_v10 = vpop.f32.mrb[1].mxu0 }
  0xde   :  { %v81_v11 = vpop.f32.mrb[2].mxu0 }
  0xdf   :  { %87 = vst.msk [vmem:[#allocation2] sm:$0xff] %vm16_vm0, %v85_v9  ;;  %v86_v12 = vadd.f32 %v81_v11, %v20_v8  ;;  %v126_v13 = vpop.f32.mrb[3].mxu0 }
  0xe1   :  { %88 = vst.msk [vmem:[#allocation2 + $0x8] sm:$0xff] %vm16_vm0, %v86_v12 }
  0xe6   :  { %v92_v14 = vld [vmem:[#allocation2] sm:$0xff] }
  0xe7   :  { %v114_v15 = vpack.c.bf16 %v92_v14, %v92_v14 }
  0xe8   :  { %v93_v16 = vld [vmem:[#allocation2 + $0x8] sm:$0xff] }
  0xe9   :  { %103 = vst.msk [vmem:[%s173_s2] sm:$0xf] %vm102_vm2, %v114_v15  ;;  %v115_v17 = vpack.c.bf16 %v93_v16, %v93_v16 }
  0xeb   :  { %104 = vst.msk [vmem:[%s173_s2 + $0x4] sm:$0xf] %vm102_vm2, %v115_v17 }

// kernel: decoder_forward.20
= control target key start
LH: loop header
LB: loop body
LE: loop exit
PB: predicated region body
PF: predicated region fallthrough
CT: control target
= control target key end

     0   :  { %vm16_vm0 = vcmask 523264   ;;  %v132_v0 = vmov 0.0   ;;  %vm133_vm1 = vmmov 0   ;;  %vm40_vm2 = vcmask 261120   ;;  %s171_s1 = inlined_call_operand.vmem [shape: bf16[32,64], index: 1, kind: input, shape index: {}]   ;;  %s172_s0 = inlined_call_operand.vmem [shape: f32[16,32], index: 0, kind: input, shape index: {}]   ;;  %s173_s2 = inlined_call_operand.vmem [shape: bf16[16,64], index: 2, kind: output, shape index: {}]  }
   0x1   :  { %120 = vmatprep.subr.bf16.mxu0 %v132_v0  ;;  %v130_v1 = vld [vmem:[%s171_s1] sm:$0xff]   ;;  %124 = vmatprep.mubr.msk.bf16.mxu0 %vm133_vm1, %v132_v0  ;;  %17 = vst.msk [vmem:[#allocation2] sm:$0xff] %vm16_vm0, %v132_v0  ;;  %18 = vst.msk [vmem:[#allocation2 + $0x8] sm:$0xff] %vm16_vm0, %v132_v0  ;;  %v131_v2 = vld [vmem:[%s171_s1 + $0x8] sm:$0xff]   ;;  %vm103_vm3 = vcmask 519168  }
   0x2   :  { %121 = vmatpush3.bf16.msra.mxu0 %v130_v1  ;;  %v21_v3 = vld [vmem:[%s172_s0] sm:$0xff]  ;;  %v22_v4 = vld [vmem:[%s172_s0 + $0x8] sm:$0xff] }
   0x3   :  { %122 = vmatprep.subr.bf16.mxu0 %v132_v0  ;;  %v23_v5 = vpack.c.bf16 %v22_v4, %v21_v3 }
   0x6   :  { %123 = vmatpush3.bf16.msra.mxu0 %v131_v2 }
   0x8   :  { %v19_v6 = vld [vmem:[#allocation2] sm:$0xff]  ;;  %v20_v8 = vld [vmem:[#allocation2 + $0x8] sm:$0xff] }
   0x9   :  { %125 = vmatmul.mubr.msk.bf16.vlgmr.msra.gmra.mrb[0].mxu0 %vm40_vm2, %v23_v5 }
  0xdc   :  { %v78_v7 = vpop.f32.mrb[0].mxu0 }
  0xdd   :  { %v85_v9 = vadd.f32 %v78_v7, %v19_v6  ;;  %v126_v10 = vpop.f32.mrb[1].mxu0 }
  0xde   :  { %v81_v11 = vpop.f32.mrb[2].mxu0 }
  0xdf   :  { %88 = vst.msk [vmem:[#allocation2] sm:$0xff] %vm16_vm0, %v85_v9  ;;  %v86_v12 = vadd.f32 %v81_v11, %v20_v8  ;;  %v127_v13 = vpop.f32.mrb[3].mxu0 }
  0xe1   :  { %89 = vst.msk [vmem:[#allocation2 + $0x8] sm:$0xff] %vm16_vm0, %v86_v12 }
  0xe6   :  { %v93_v14 = vld [vmem:[#allocation2] sm:$0xff] }
  0xe7   :  { %v115_v15 = vpack.c.bf16 %v93_v14, %v93_v14 }
  0xe8   :  { %v94_v16 = vld [vmem:[#allocation2 + $0x8] sm:$0xff] }
  0xe9   :  { %104 = vst.msk [vmem:[%s173_s2] sm:$0xf] %vm103_vm3, %v115_v15  ;;  %v116_v17 = vpack.c.bf16 %v94_v16, %v94_v16 }
  0xeb   :  { %105 = vst.msk [vmem:[%s173_s2 + $0x4] sm:$0xf] %vm103_vm3, %v116_v17 }

// kernel: decoder_forward.23
= control target key start
LH: loop header
LB: loop body
LE: loop exit
PB: predicated region body
PF: predicated region fallthrough
CT: control target
= control target key end

     0   :  { %vm25_vm0 = vcmask 261120   ;;  %v288_v0 = vmov 0.0   ;;  %vm289_vm1 = vmmov 0   ;;  %vm129_vm2 = vcmask 523264   ;;  %s367_s1 = inlined_call_operand.vmem [shape: bf16[32,64], index: 1, kind: input, shape index: {}]   ;;  %s368_s0 = inlined_call_operand.vmem [shape: f32[16,32], index: 0, kind: input, shape index: {}]   ;;  %s369_s2 = inlined_call_operand.vmem [shape: bf16[64,32], index: 2, kind: input, shape index: {}]   ;;  %s370_s3 = inlined_call_operand.vmem [shape: f32[1,32], index: 3, kind: input, shape index: {}]   ;;  %s371_s4 = inlined_call_operand.vmem [shape: f32[1,32], index: 4, kind: input, shape index: {}]   ;;  %s372_s5 = inlined_call_operand.vmem [shape: f32[16,32], index: 5, kind: output, shape index: {}]  }
   0x1   :  { %256 = vmatprep.subr.bf16.mxu0 %v288_v0  ;;  %v278_v1 = vld [vmem:[%s367_s1] sm:$0xff]   ;;  %260 = vmatprep.mubr.msk.bf16.mxu0 %vm289_vm1, %v288_v0  ;;  %26 = vst.msk [vmem:[#allocation2] sm:$0xff] %vm25_vm0, %v288_v0  ;;  %27 = vst.msk [vmem:[#allocation2 + $0x8] sm:$0xff] %vm25_vm0, %v288_v0  ;;  %v279_v2 = vld [vmem:[%s367_s1 + $0x8] sm:$0xff]  }
   0x2   :  { %264 = vmatprep.subr.bf16.mxu1 %v288_v0  ;;  %272 = vmatprep.mubr.msk.bf16.mxu1 %vm289_vm1, %v288_v0  ;;  %v28_v3 = vld [vmem:[%s368_s0] sm:$0xff]  ;;  %v29_v4 = vld [vmem:[%s368_s0 + $0x8] sm:$0xff]  ;;  %v282_v8 = vld [vmem:[%s369_s2 + $0x10] sm:$0xff]  }
   0x3   :  { %257 = vmatpush3.bf16.msra.mxu0 %v278_v1  ;;  %v280_v5 = vld [vmem:[%s369_s2] sm:$0xff]   ;;  %v281_v6 = vld [vmem:[%s369_s2 + $0x8] sm:$0xff]   ;;  %v30_v7 = vpack.c.bf16 %v29_v4, %v28_v3  ;;  %v283_v9 = vld [vmem:[%s369_s2 + $0x18] sm:$0xff]  }
   0x4   :  { %258 = vmatprep.subr.bf16.mxu0 %v288_v0  ;;  %265 = vmatpush3.bf16.msra.mxu1 %v280_v5  ;;  %v246_v48 = vld [vmem:[%s370_s3] ss:$0 sm:$0xff] }
   0x5   :  { %266 = vmatprep.subr.bf16.mxu1 %v288_v0  ;;  %v247_v50 = vld [vmem:[%s371_s4] ss:$0 sm:$0xff] }
   0x7   :  { %259 = vmatpush3.bf16.msra.mxu0 %v279_v2 }
   0x8   :  { %267 = vmatpush3.bf16.msra.mxu1 %v281_v6  ;;  %v94_v17 = vld [vmem:[#allocation2] sm:$0xff]  ;;  %v95_v19 = vld [vmem:[#allocation2 + $0x8] sm:$0xff] }
   0x9   :  { %268 = vmatprep.subr.bf16.mxu1 %v288_v0 }
   0xa   :  { %261 = vmatmul.mubr.msk.bf16.vlgmr.msra.gmra.mrb[0].mxu0 %vm25_vm0, %v30_v7 }
   0xc   :  { %269 = vmatpush3.bf16.msra.mxu1 %v282_v8 }
   0xd   :  { %270 = vmatprep.subr.bf16.mxu1 %v288_v0 }
  0x10   :  { %271 = vmatpush3.bf16.msra.mxu1 %v283_v9 }
  0xdd   :  { %v85_v10 = vpop.f32.mrb[0].mxu0 }
  0xde   :  { %v262_v11 = vpop.f32.mrb[1].mxu0  ;;  %v92_v13 = vmax.f32 %v85_v10, 0.0 }
  0xdf   :  { %v88_v12 = vpop.f32.mrb[2].mxu0 }
  0xe0   :  { %v93_v14 = vmax.f32 %v88_v12, 0.0  ;;  %v263_v15 = vpop.f32.mrb[3].mxu0 }
  0xe2   :  { %v96_v16 = vpack.c.bf16 %v93_v14, %v92_v13 }
  0xe4   :  { %273 = vmatmul.mubr.msk.bf16.vlgmr.msra.gmra.mrb[0].mxu1 %vm129_vm2, %v96_v16 }
 0x1b7   :  { %v167_v18 = vpop.f32.mrb[0].mxu1 }
 0x1b8   :  { %v174_v20 = vadd.f32 %v167_v18, %v94_v17  ;;  %v274_v21 = vpop.f32.mrb[1].mxu1 }
 0x1b9   :  { %v170_v22 = vpop.f32.mrb[2].mxu1 }
 0x1ba   :  { %176 = vst.msk [vmem:[#allocation2] sm:$0xff] %vm25_vm0, %v174_v20  ;;  %v175_v23 = vadd.f32 %v170_v22, %v95_v19  ;;  %v275_v24 = vpop.f32.mrb[3].mxu1 }
 0x1bc   :  { %177 = vst.msk [vmem:[#allocation2 + $0x8] sm:$0xff] %vm25_vm0, %v175_v23 }
 0x1c1   :  { %v181_v25 = vld [vmem:[#allocation2] sm:$0xff] }
 0x1c2   :  { %v185_v26 = vadd.f32 %v181_v25, %v28_v3 }
 0x1c3   :  { %v182_v27 = vld [vmem:[#allocation2 + $0x8] sm:$0xff] }
 0x1c4   :  { %v187_v28 = vsel %vm25_vm0, %v185_v26, 0.0  ;;  %v186_v29 = vadd.f32 %v182_v27, %v29_v4 }
 0x1c5   :  { %188 = vadd.xlane.f32.xlu0 %v187_v28 }
 0x1c6   :  { %v190_v30 = vsel %vm25_vm0, %v186_v29, 0.0 }
 0x1c9   :  { %191 = vadd.xlane.f32.xlu0 %v190_v30 }
 0x252   :  { %v189_v31 = vpop.xlane.xlu0 %188 }
 0x253   :  { %v194_v32 = vmul.f32 0.03125, %v189_v31 }
 0x255   :  { %v196_v33 = vsub.f32 %v185_v26, %v194_v32 }
 0x256   :  { %v192_v34 = vpop.xlane.xlu0 %191 }
 0x257   :  { %v195_v35 = vmul.f32 0.03125, %v192_v34  ;;  %v198_v36 = vmul.f32 %v196_v33, %v196_v33 }
 0x259   :  { %v197_v37 = vsub.f32 %v186_v29, %v195_v35  ;;  %v200_v38 = vsel %vm25_vm0, %v198_v36, 0.0 }
 0x25a   :  { %201 = vadd.xlane.f32.xlu1 %v200_v38 }
 0x25b   :  { %v199_v39 = vmul.f32 %v197_v37, %v197_v37 }
 0x25d   :  { %v203_v40 = vsel %vm25_vm0, %v199_v39, 0.0 }
 0x25e   :  { %204 = vadd.xlane.f32.xlu1 %v203_v40 }
 0x2e7   :  { %v202_v41 = vpop.xlane.xlu1 %201 }
 0x2e8   :  { %v206_v42 = vmul.f32 0.03125, %v202_v41 }
 0x2ea   :  { %v208_v43 = vadd.f32 1e-05, %v206_v42 }
 0x2eb   :  { %v205_v44 = vpop.xlane.xlu1 %204 }
 0x2ec   :  { %284 = vrsqrt.f32 %v208_v43  ;;  %v207_v45 = vmul.f32 0.03125, %v205_v44 }
 0x2ee   :  { %v209_v46 = vadd.f32 1e-05, %v207_v45 }
 0x2f0   :  { %286 = vrsqrt.f32 %v209_v46 }
 0x2f6   :  { %v285_v47 = vpop.eup %284 }
 0x2f7   :  { %v212_v49 = vmul.f32 %v285_v47, %v196_v33 }
 0x2f9   :  { %v221_v51 = vmul.f32 %v246_v48, %v212_v49 }
 0x2fa   :  { %v287_v52 = vpop.eup %286 }
 0x2fb   :  { %v230_v53 = vadd.f32 %v247_v50, %v221_v51  ;;  %v213_v54 = vmul.f32 %v287_v52, %v197_v37 }
 0x2fd   :  { %232 = vst.msk [vmem:[%s372_s5] sm:$0xff] %vm25_vm0, %v230_v53  ;;  %v222_v55 = vmul.f32 %v246_v48, %v213_v54 }
 0x2ff   :  { %v231_v56 = vadd.f32 %v247_v50, %v222_v55 }
 0x301   :  { %233 = vst.msk [vmem:[%s372_s5 + $0x8] sm:$0xff] %vm25_vm0, %v231_v56 }

// kernel: decoder_forward.31
= control target key start
LH: loop header
LB: loop body
LE: loop exit
PB: predicated region body
PF: predicated region fallthrough
CT: control target
= control target key end

     0   :  { %v328_v1 = vmov 0.0   ;;  %vm329_vm0 = vmmov 0   ;;  %vm26_vm1 = vcmask 261120   ;;  %s416_s0 = inlined_call_operand.vmem [shape: f32[16,32], index: 0, kind: input, shape index: {}]   ;;  %s417_s1 = inlined_call_operand.vmem [shape: bf16[32,64], index: 1, kind: input, shape index: {}]   ;;  %s418_s2 = inlined_call_operand.vmem [shape: bf16[64,32], index: 2, kind: input, shape index: {}]   ;;  %s419_s3 = inlined_call_operand.vmem [shape: f32[1,32], index: 3, kind: input, shape index: {}]   ;;  %s420_s4 = inlined_call_operand.vmem [shape: f32[1,32], index: 4, kind: input, shape index: {}]   ;;  %s421_s5 = inlined_call_operand.hbm [shape: f32[16,32], index: 5, kind: output, shape index: {}]  }
   0x1   :  { %v294_v0 = vld [vmem:[%s417_s1] sm:$0xff]   ;;  %269 = vmatprep.subr.bf16.mxu0 %v328_v1  ;;  %v295_v2 = vld [vmem:[%s417_s1 + $0x8] sm:$0xff]   ;;  %277 = vmatprep.subr.bf16.mxu1 %v328_v1  ;;  %27 = vst.msk [vmem:[#allocation2] sm:$0xff] %vm26_vm1, %v328_v1  ;;  %28 = vst.msk [vmem:[#allocation2 + $0x8] sm:$0xff] %vm26_vm1, %v328_v1 }
   0x2   :  { %270 = vmatpush3.bf16.msra.mxu0 %v294_v0  ;;  %273 = vmatprep.mubr.msk.bf16.mxu0 %vm329_vm0, %v328_v1  ;;  %v29_v3 = vld [vmem:[%s416_s0] sm:$0xff]  ;;  %v30_v4 = vld [vmem:[%s416_s0 + $0x8] sm:$0xff] }
   0x3   :  { %271 = vmatprep.subr.bf16.mxu0 %v328_v1  ;;  %v296_v5 = vld [vmem:[%s418_s2] sm:$0xff]   ;;  %285 = vmatprep.mubr.msk.bf16.mxu1 %vm329_vm0, %v328_v1  ;;  %v297_v6 = vld [vmem:[%s418_s2 + $0x8] sm:$0xff]   ;;  %v31_v7 = vpack.c.bf16 %v30_v4, %v29_v3 }
   0x4   :  { %278 = vmatpush3.bf16.msra.mxu1 %v296_v5 }
   0x5   :  { %279 = vmatprep.subr.bf16.mxu1 %v328_v1 }
   0x6   :  { %272 = vmatpush3.bf16.msra.mxu0 %v295_v2 }
   0x7   :  { %10 = vsyncpa [#allocation4], 0  ;;  %v298_v8 = vld [vmem:[%s418_s2 + $0x10] sm:$0xff]   ;;  %v299_v9 = vld [vmem:[%s418_s2 + $0x18] sm:$0xff]   ;;  %vm130_vm2 = vcmask 523264   ;;  %s330_s10 = smov [#allocation3]  }
   0x8   :  { %280 = vmatpush3.bf16.msra.mxu1 %v297_v6  ;;  %v95_v17 = vld [vmem:[#allocation2] sm:$0xff]  ;;  %v96_v19 = vld [vmem:[#allocation2 + $0x8] sm:$0xff]  ;;  %s240_s11 = sshll.u32 %s330_s10, 4  ;;  %s241_s11 = int_to_ptr.vmem [resolvable:$true] %s240_s11 }
   0x9   :  { %274 = vmatmul.mubr.msk.bf16.vlgmr.msra.gmra.mrb[0].mxu0 %vm26_vm1, %v31_v7  ;;  %281 = vmatprep.subr.bf16.mxu1 %v328_v1  ;;  %v259_v48 = vld [vmem:[%s419_s3] ss:$0 sm:$0xff]  ;;  %s304_s12 = scalar_lea.vmem %s241_s11, 256  ;;  %p309_p1 = scmp.lt.s32.totalorder %s241_s11, %s241_s11 }
   0xa   :  { %v260_v50 = vld [vmem:[%s420_s4] ss:$0 sm:$0xff]  ;;  %p305_p0 = scmp.ne.s32.totalorder %s241_s11, %s304_s12  ;;  %p310_p2 = scmp.lt.s32.totalorder %s304_s12, %s304_s12 }
   0xc   :  { %282 = vmatpush3.bf16.msra.mxu1 %v298_v8  ;;  %p311_p3 = por %p310_p2, %p309_p1 }
   0xd   :  { %283 = vmatprep.subr.bf16.mxu1 %v328_v1 }
   0xe   :  { %p312_p4 = pnand %p311_p3, %p305_p0 }
  0x10   :  { %284 = vmatpush3.bf16.msra.mxu1 %v299_v9 }
  0xdc   :  { %v86_v10 = vpop.f32.mrb[0].mxu0 }
  0xdd   :  { %v275_v11 = vpop.f32.mrb[1].mxu0  ;;  %v93_v13 = vmax.f32 %v86_v10, 0.0 }
  0xde   :  { %v89_v12 = vpop.f32.mrb[2].mxu0 }
  0xdf   :  { %v94_v14 = vmax.f32 %v89_v12, 0.0  ;;  %v276_v15 = vpop.f32.mrb[3].mxu0 }
  0xe1   :  { %v97_v16 = vpack.c.bf16 %v94_v14, %v93_v13 }
  0xe3   :  { %286 = vmatmul.mubr.msk.bf16.vlgmr.msra.gmra.mrb[0].mxu1 %vm130_vm2, %v97_v16 }
 0x1b6   :  { %v168_v18 = vpop.f32.mrb[0].mxu1 }
 0x1b7   :  { %v175_v20 = vadd.f32 %v168_v18, %v95_v17  ;;  %v287_v21 = vpop.f32.mrb[1].mxu1 }
 0x1b8   :  { %v171_v22 = vpop.f32.mrb[2].mxu1 }
 0x1b9   :  { %177 = vst.msk [vmem:[#allocation2] sm:$0xff] %vm26_vm1, %v175_v20  ;;  %v176_v23 = vadd.f32 %v171_v22, %v96_v19  ;;  %v288_v24 = vpop.f32.mrb[3].mxu1 }
 0x1bb   :  { %178 = vst.msk [vmem:[#allocation2 + $0x8] sm:$0xff] %vm26_vm1, %v176_v23 }
 0x1c0   :  { %v182_v25 = vld [vmem:[#allocation2] sm:$0xff] }
 0x1c1   :  { %v186_v26 = vadd.f32 %v182_v25, %v29_v3 }
 0x1c2   :  { %v183_v27 = vld [vmem:[#allocation2 + $0x8] sm:$0xff] }
 0x1c3   :  { %v188_v28 = vsel %vm26_vm1, %v186_v26, 0.0  ;;  %v187_v29 = vadd.f32 %v183_v27, %v30_v4 }
 0x1c4   :  { %189 = vadd.xlane.f32.xlu0 %v188_v28 }
 0x1c5   :  { %v191_v30 = vsel %vm26_vm1, %v187_v29, 0.0 }
 0x1c8   :  { %192 = vadd.xlane.f32.xlu0 %v191_v30 }
 0x251   :  { %v190_v31 = vpop.xlane.xlu0 %189 }
 0x252   :  { %v195_v32 = vmul.f32 0.03125, %v190_v31 }
 0x254   :  { %v197_v33 = vsub.f32 %v186_v26, %v195_v32 }
 0x255   :  { %v193_v34 = vpop.xlane.xlu0 %192 }
 0x256   :  { %v196_v35 = vmul.f32 0.03125, %v193_v34  ;;  %v199_v36 = vmul.f32 %v197_v33, %v197_v33 }
 0x258   :  { %v198_v37 = vsub.f32 %v187_v29, %v196_v35  ;;  %v201_v38 = vsel %vm26_vm1, %v199_v36, 0.0 }
 0x259   :  { %202 = vadd.xlane.f32.xlu1 %v201_v38 }
 0x25a   :  { %v200_v39 = vmul.f32 %v198_v37, %v198_v37 }
 0x25c   :  { %v204_v40 = vsel %vm26_vm1, %v200_v39, 0.0 }
 0x25d   :  { %205 = vadd.xlane.f32.xlu1 %v204_v40 }
 0x2e6   :  { %v203_v41 = vpop.xlane.xlu1 %202 }
 0x2e7   :  { %v207_v42 = vmul.f32 0.03125, %v203_v41 }
 0x2e9   :  { %v209_v43 = vadd.f32 1e-05, %v207_v42 }
 0x2ea   :  { %v206_v44 = vpop.xlane.xlu1 %205 }
 0x2eb   :  { %300 = vrsqrt.f32 %v209_v43  ;;  %v208_v45 = vmul.f32 0.03125, %v206_v44 }
 0x2ed   :  { %v210_v46 = vadd.f32 1e-05, %v208_v45 }
 0x2ef   :  { %302 = vrsqrt.f32 %v210_v46 }
 0x2f5   :  { %v301_v47 = vpop.eup %300 }
 0x2f6   :  { %v213_v49 = vmul.f32 %v301_v47, %v197_v33 }
 0x2f8   :  { %v222_v51 = vmul.f32 %v259_v48, %v213_v49 }
 0x2f9   :  { %v303_v52 = vpop.eup %302 }
 0x2fa   :  { %v214_v53 = vmul.f32 %v303_v52, %v198_v37  ;;  %v231_v54 = vadd.f32 %v260_v50, %v222_v51 }
 0x2fc   :  { %v223_v55 = vmul.f32 %v259_v48, %v214_v53  ;;  %233 = vst.msk [vmem:[#allocation3] sm:$0xff] %vm26_vm1, %v231_v54 }
 0x2fe   :  { %v232_v56 = vadd.f32 %v260_v50, %v223_v55 }
 0x300   :  { %234 = vst.msk [vmem:[#allocation3 + $0x8] sm:$0xff] %vm26_vm1, %v232_v56 }
 0x301   :  { %315 = shalt.err (!%p312_p4)
}
 0x302   :  { %s316_s13 = scalar_lea.hbm %s421_s5, 256 }
 0x303   :  { %p317_p5 = scmp.ne.s32.totalorder %s421_s5, %s316_s13  ;;  %p320_p6 = scmp.lt.u32.totalorder %s316_s13, %s421_s5 }
 0x305   :  { %p322_p7 = pnand %p320_p6, %p317_p5 }
 0x307   :  { %325 = shalt.err (!%p322_p7)
}
 0x308   :  { %s331_s18 = smov 128   ;;  %s332_s19 = smov 8  }
 0x309   :  { %246 = dma.vmem_to_hbm [thread:$0]  %s241_s11, 256, %s421_s5, [#allocation4], %s331_s18, %s331_s18, %s332_s19  }
 0x30a   :  { %326 = dma.done.wait [#allocation4], 256  }
 0x30b   :  { %327 = vsyncadd [#allocation4], 4294967040 }
 0x30c   :  { %250 = vsyncpa [#allocation4], 1 }

</bundles_post_ra>
